<compile_context>
chip_gen: v5e
topology: v5e:2x2
jax: 0.10.0
libtpu: 0.0.40
codegen_flags: <defaults>
</compile_context>

<pallas_src>
import jax
import jax.numpy as jnp
import numpy as np
from jax.experimental import pallas as pl
from jax.experimental.pallas import tpu as pltpu


# ---------------------------------------------------------------------------
# Host-side constant / weight preparation
# ---------------------------------------------------------------------------

def _interp_matrix_np(out_size, in_size):
    """Row-stochastic bilinear interpolation matrix (align_corners=True)."""
    if in_size == 1:
        return np.ones((out_size, 1), np.float32)
    pos = np.arange(out_size, dtype=np.float64) * (in_size - 1) / (out_size - 1)
    lo = np.floor(pos).astype(np.int64)
    hi = np.minimum(lo + 1, in_size - 1)
    frac = (pos - lo).astype(np.float32)
    M = np.zeros((out_size, in_size), np.float32)
    M[np.arange(out_size), lo] += 1.0 - frac
    M[np.arange(out_size), hi] += frac
    return M


def _make_band(wslab, W):
    """(5,5,Cin,Cout) kernel slab -> (5, W*Cin, W*Cout) band matrices.

    The conv's own width padding (pad=2) is folded in:
      B[ky, wp*Cin + c, w*Cout + o] = wslab[ky, wp - w + 2, c, o]  if 0 <= wp - w + 2 < 5 else 0
    so the contraction runs over the UNPADDED width (K = W*Cin exactly).
    """
    K5, _, Cin, Cout = wslab.shape
    P = np.zeros((K5, W, W), np.float32)          # P[kx, wp, w] = 1 iff wp == w + kx - 2
    for kx in range(K5):
        w = np.arange(W)
        wp = w + kx - 2
        ok = (wp >= 0) & (wp < W)
        P[kx, wp[ok], w[ok]] = 1.0
    B = jnp.einsum('xpw,yxco->ypcwo', jnp.asarray(P), wslab)   # (5, W, Cin, W, Cout)
    return B.reshape(K5, W * Cin, W * Cout)


def _chan_mats(W, C):
    """(W*C, C) channel-sum matrix and its transpose (channel -> lane broadcast)."""
    S = np.tile(np.eye(C, dtype=np.float32), (W, 1))
    return jnp.asarray(S), jnp.asarray(S.T)


# ---------------------------------------------------------------------------
# Fused Up.forward (one pallas_call)
# ---------------------------------------------------------------------------

def _up_forward(x1, x2, p):
    N, h_in, w_in, C1 = x1.shape
    N2, H, W, C1b = x2.shape
    assert N2 == N and C1b == C1
    Hup, Wup = 2 * h_in, 2 * w_in
    dY, dX = H - Hup, W - Wup
    assert dY >= 0 and dX >= 0

    mid = p['w13'].shape[-1]
    Cout = p['w23'].shape[-1]
    Cin1 = 2 * C1            # channels after torch.cat([x2, x1])
    Cmid = 2 * mid           # channels after cat(conv_13, conv_15)
    Cfin = 2 * Cout          # channels after cat(conv_23, conv_25)
    assert p['w13'].shape[2] == Cin1 and p['w23'].shape[2] == Cmid

    K1 = 2 * W * C1          # stage-1 per-band lanes: [x2 row (W*C1) | upsampled-x1 row (W*C1)]
    K2 = W * Cmid            # stage-2 per-band lanes
    Nout1 = W * Cmid
    Nout2 = W * Cfin

    # ---- interp matrices (bilinear x2, align_corners=True) with F.pad folded in, bf16 ----
    Mh = _interp_matrix_np(Hup, h_in)
    Mh_blk = jnp.asarray(np.kron(np.eye(N, dtype=np.float32), Mh)
                         ).astype(jnp.bfloat16)                            # (N*Hup, N*h_in)
    Mw = _interp_matrix_np(Wup, w_in)
    Mw_pad = np.zeros((W, w_in), np.float32)
    Mw_pad[dX // 2: dX // 2 + Wup, :] = Mw                                  # width pad placement
    Kw = jnp.asarray(np.einsum('pj,cd->jcpd', Mw_pad, np.eye(C1, dtype=np.float32))
                     .reshape(w_in * C1, W * C1)).astype(jnp.bfloat16)      # (w_in*C1, W*C1)

    # ---- fused 3x3(+pad to 5x5) | 5x5 weight slabs -> concatenated band matrices ----
    wslab1 = jnp.concatenate(
        [jnp.pad(p['w13'], ((1, 1), (1, 1), (0, 0), (0, 0))), p['w15']], axis=-1)  # (5,5,Cin1,Cmid)
    wslab2 = jnp.concatenate(
        [jnp.pad(p['w23'], ((1, 1), (1, 1), (0, 0), (0, 0))), p['w25']], axis=-1)  # (5,5,Cmid,Cfin)
    B1 = jnp.concatenate([_make_band(wslab1[:, :, :C1, :], W),     # x2 half of each band
                          _make_band(wslab1[:, :, C1:, :], W)],    # x1 half of each band
                         axis=1).reshape(5 * K1, Nout1).astype(jnp.bfloat16)        # (640, W*Cmid)
    B2 = _make_band(wslab2, W).reshape(5 * K2, Nout2).astype(jnp.bfloat16)          # (640, W*Cfin)

    S1, S1T = _chan_mats(W, Cmid)
    S2, S2T = _chan_mats(W, Cfin)
    g1 = p['g1'].reshape(1, Cmid).astype(jnp.float32)
    bt1 = p['beta1'].reshape(1, Cmid).astype(jnp.float32)
    g2 = p['g2'].reshape(1, Cfin).astype(jnp.float32)
    bt2 = p['beta2'].reshape(1, Cfin).astype(jnp.float32)
    # Conv biases b13/b15/b23/b25 cancel exactly under training-mode BatchNorm -> not passed.

    x1f = x1.reshape(N * h_in, w_in * C1).astype(jnp.bfloat16)
    x2f = x2.reshape(N, H, W * C1).astype(jnp.bfloat16)

    cnt = float(N * H * W)
    pt, pb = dY // 2, dY - dY // 2

    def shift_h(v, s):
        # v: (N, H, L) register value; y[:, h] = v[:, h + s], zero outside [0, H).
        if s == 0:
            return v
        z = jnp.zeros((N, abs(s), v.shape[-1]), v.dtype)
        if s > 0:
            return jnp.concatenate([v[:, s:, :], z], axis=1)
        return jnp.concatenate([z, v[:, :s, :]], axis=1)

    def im2col(rows):
        # rows: (N, H, K) bf16 -> (N*H, 5*K); band ky sits at 128-aligned lanes [ky*K, (ky+1)*K).
        bands = [shift_h(rows, ky - 2) for ky in range(5)]
        return jnp.concatenate(bands, axis=-1).reshape(N * H, 5 * rows.shape[-1])

    def bn_relu(acc, s_ref, st_ref, g_ref, bt_ref):
        # Training-mode BN (batch stats, biased var, eps=1e-5) + ReLU, channel reduce/bcast on MXU.
        stats = jnp.concatenate([jnp.sum(acc, axis=0, keepdims=True),
                                 jnp.sum(acc * acc, axis=0, keepdims=True)], axis=0)   # (2, Nout)
        ch = jnp.dot(stats, s_ref[...], preferred_element_type=jnp.float32) / cnt       # (2, C)
        mean, ex2 = ch[0:1], ch[1:2]
        inv = jax.lax.rsqrt(ex2 - mean * mean + 1e-5)
        sc = g_ref[...] * inv
        sh = bt_ref[...] - mean * sc
        ssb = jnp.dot(jnp.concatenate([sc, sh], axis=0), st_ref[...],
                      preferred_element_type=jnp.float32)                               # (2, Nout)
        return jnp.maximum(acc * ssb[0:1] + ssb[1:2], 0.0)

    def kernel(x1_ref, x2_ref, mh_ref, kw_ref,
               b1_ref, g1_ref, bt1_ref, s1_ref, s1t_ref,
               b2_ref, g2_ref, bt2_ref, s2_ref, s2t_ref,
               out_ref):
        # ---- bilinear upsample(x1) + F.pad: 2 small bf16 matmuls for the whole batch ----
        uh = jnp.dot(mh_ref[...], x1_ref[...], preferred_element_type=jnp.float32)   # (N*Hup, w_in*C1)
        uw = jnp.dot(uh.astype(jnp.bfloat16), kw_ref[...],
                     preferred_element_type=jnp.float32)                             # (N*Hup, W*C1)
        x1r = uw.astype(jnp.bfloat16).reshape(N, Hup, W * C1)
        if pt or pb:
            x1r = jnp.pad(x1r, ((0, 0), (pt, pb), (0, 0)))                           # height pad
        # torch.cat([x2, x1], dim=1): 128-lane rows, x2 first.
        rows1 = jnp.concatenate([x2_ref[...], x1r], axis=-1)                         # (N, H, K1)

        # ---- stage 1: fused conv3x3|conv5x5 == ONE (N*H,640)x(640,W*Cmid) matmul + BN + ReLU ----
        acc1 = jnp.dot(im2col(rows1), b1_ref[...], preferred_element_type=jnp.float32)
        h1 = bn_relu(acc1, s1_ref, s1t_ref, g1_ref, bt1_ref)                         # (N*H, W*Cmid)

        # ---- stage 2: same structure, ONE matmul + BN + ReLU, single lane-dense store ----
        rows2 = h1.astype(jnp.bfloat16).reshape(N, H, K2)
        acc2 = jnp.dot(im2col(rows2), b2_ref[...], preferred_element_type=jnp.float32)
        out_ref[...] = bn_relu(acc2, s2_ref, s2t_ref, g2_ref, bt2_ref)

    out_flat = pl.pallas_call(
        kernel,
        out_shape=jax.ShapeDtypeStruct((N * H, Nout2), jnp.float32),
        in_specs=[pl.BlockSpec(memory_space=pltpu.MemorySpace.VMEM)] * 14,
        out_specs=pl.BlockSpec(memory_space=pltpu.MemorySpace.VMEM),
    )(x1f, x2f, Mh_blk, Kw, B1, g1, bt1, S1, S1T, B2, g2, bt2, S2, S2T)

    # Free reshape: (N*H, W*Cfin) row-major == (N, H, W, Cfin).
    return out_flat.reshape(N, H, W, Cfin)


up_forward = jax.jit(_up_forward)


# ---------------------------------------------------------------------------
# Pure-JAX reference (independent correctness check, f32 everywhere, with biases)
# ---------------------------------------------------------------------------

def _bilinear_up_ref(x):
    N, H, W, C = x.shape
    Mh = jnp.asarray(_interp_matrix_np(2 * H, H))
    Mw = jnp.asarray(_interp_matrix_np(2 * W, W))
    y = jnp.einsum('oh,nhwc->nowc', Mh, x)
    y = jnp.einsum('pw,nowc->nopc', Mw, y)
    return y


def _conv_ref(x, w, b, pad):
    y = jax.lax.conv_general_dilated(
        x, w, window_strides=(1, 1), padding=[(pad, pad), (pad, pad)],
        dimension_numbers=('NHWC', 'HWIO', 'NHWC'))
    return y + b.reshape(1, 1, 1, -1)


def _bn_relu_ref(x, g, b):
    mean = jnp.mean(x, axis=(0, 1, 2), keepdims=True)
    var = jnp.mean((x - mean) ** 2, axis=(0, 1, 2), keepdims=True)
    y = (x - mean) * jax.lax.rsqrt(var + 1e-5) * g.reshape(1, 1, 1, -1) + b.reshape(1, 1, 1, -1)
    return jnp.maximum(y, 0.0)


def up_forward_ref(x1, x2, p):
    x1u = _bilinear_up_ref(x1)
    dY = x2.shape[1] - x1u.shape[1]
    dX = x2.shape[2] - x1u.shape[2]
    x1u = jnp.pad(x1u, ((0, 0), (dY // 2, dY - dY // 2), (dX // 2, dX - dX // 2), (0, 0)))
    x = jnp.concatenate([x2, x1u], axis=-1)
    h = jnp.concatenate([_conv_ref(x, p['w13'], p['b13'], 1),
                         _conv_ref(x, p['w15'], p['b15'], 2)], axis=-1)
    h = _bn_relu_ref(h, p['g1'], p['beta1'])
    h = jnp.concatenate([_conv_ref(h, p['w23'], p['b23'], 1),
                         _conv_ref(h, p['w25'], p['b25'], 2)], axis=-1)
    h = _bn_relu_ref(h, p['g2'], p['beta2'])
    return h


# ---------------------------------------------------------------------------
# Deterministic parameter init (shapes match Up(in_ch, out_ch, bilinear=True))
# ---------------------------------------------------------------------------

def init_params(key, in_channels, out_channels):
    mid = in_channels // 2                     # DoubleConv mid_channels = in_channels // 2
    ks = jax.random.split(key, 12)

    def w(k, shape, fan_in):
        return (jax.random.normal(k, shape, jnp.float32) / np.sqrt(fan_in)).astype(jnp.float32)

    return {
        'w13': w(ks[0], (3, 3, in_channels, mid), 9 * in_channels),
        'b13': 0.1 * jax.random.normal(ks[1], (mid,), jnp.float32),
        'w15': w(ks[2], (5, 5, in_channels, mid), 25 * in_channels),
        'b15': 0.1 * jax.random.normal(ks[3], (mid,), jnp.float32),
        'g1': 1.0 + 0.1 * jax.random.normal(ks[4], (2 * mid,), jnp.float32),
        'beta1': 0.1 * jax.random.normal(ks[5], (2 * mid,), jnp.float32),
        'w23': w(ks[6], (3, 3, 2 * mid, out_channels), 9 * 2 * mid),
        'b23': 0.1 * jax.random.normal(ks[7], (out_channels,), jnp.float32),
        'w25': w(ks[8], (5, 5, 2 * mid, out_channels), 25 * 2 * mid),
        'b25': 0.1 * jax.random.normal(ks[9], (out_channels,), jnp.float32),
        'g2': 1.0 + 0.1 * jax.random.normal(ks[10], (2 * out_channels,), jnp.float32),
        'beta2': 0.1 * jax.random.normal(ks[11], (2 * out_channels,), jnp.float32),
    }


# ---------------------------------------------------------------------------
# Main
# ---------------------------------------------------------------------------

if __name__ == "__main__":
    key = jax.random.PRNGKey(0)
    k1, k2, kp = jax.random.split(key, 3)

    in_channels, out_channels = 8, 8           # Up(8, 8, bilinear=True)
    N = 2
    # NHWC; PyTorch-equivalent NCHW shapes are x1=(2,4,8,8), x2=(2,4,16,16).
    x1 = jax.random.normal(k1, (N, 8, 8, in_channels // 2), jnp.float32)
    x2 = jax.random.normal(k2, (N, 16, 16, in_channels // 2), jnp.float32)
    params = init_params(kp, in_channels, out_channels)

    out = jax.block_until_ready(up_forward(x1, x2, params))
    ref = jax.block_until_ready(up_forward_ref(x1, x2, params))

    assert out.shape == (N, 16, 16, 2 * out_channels), out.shape
    # bf16 MXU inputs (incl. interp matrices) with f32 accumulation vs pure-f32 reference.
    np.testing.assert_allclose(np.asarray(out), np.asarray(ref), rtol=2.5e-2, atol=2.5e-2)
    print("KERNEL_OK")
</pallas_src>

<mosaic_0001>
module attributes {stable_mosaic.version = 11 : i64} {
  func.func @kernel(%arg0: memref<16x32xbf16, #tpu.memory_space<vmem>>, %arg1: memref<2x16x64xbf16, #tpu.memory_space<vmem>>, %arg2: memref<32x16xbf16, #tpu.memory_space<vmem>>, %arg3: memref<32x64xbf16, #tpu.memory_space<vmem>>, %arg4: memref<640x128xbf16, #tpu.memory_space<vmem>>, %arg5: memref<1x8xf32, #tpu.memory_space<vmem>>, %arg6: memref<1x8xf32, #tpu.memory_space<vmem>>, %arg7: memref<128x8xf32, #tpu.memory_space<vmem>>, %arg8: memref<8x128xf32, #tpu.memory_space<vmem>>, %arg9: memref<640x256xbf16, #tpu.memory_space<vmem>>, %arg10: memref<1x16xf32, #tpu.memory_space<vmem>>, %arg11: memref<1x16xf32, #tpu.memory_space<vmem>>, %arg12: memref<256x16xf32, #tpu.memory_space<vmem>>, %arg13: memref<16x256xf32, #tpu.memory_space<vmem>>, %arg14: memref<32x256xf32, #tpu.memory_space<vmem>>) attributes {dimension_semantics = [], scalar_prefetch = 0 : i64, scratch_operands = 0 : i64, tpu.core_type = #tpu.core_type<tc>} {
    %c0 = arith.constant 0 : index
    %c0_0 = arith.constant 0 : index
    %0 = vector.load %arg2[%c0, %c0_0] : memref<32x16xbf16, #tpu.memory_space<vmem>>, vector<32x16xbf16>
    %c0_1 = arith.constant 0 : index
    %c0_2 = arith.constant 0 : index
    %1 = vector.load %arg0[%c0_1, %c0_2] : memref<16x32xbf16, #tpu.memory_space<vmem>>, vector<16x32xbf16>
    %cst = arith.constant dense<0.000000e+00> : vector<32x32xf32>
    %2 = tpu.matmul %0, %1, %cst {dimension_numbers = #tpu.dot_dimension_numbers<[1], [0], [0], [1], [0, 0, 1, 1], [], []>} : vector<32x16xbf16>, vector<16x32xbf16>, vector<32x32xf32> -> vector<32x32xf32>
    %3 = arith.truncf %2 : vector<32x32xf32> to vector<32x32xbf16>
    %c0_3 = arith.constant 0 : index
    %c0_4 = arith.constant 0 : index
    %4 = vector.load %arg3[%c0_3, %c0_4] : memref<32x64xbf16, #tpu.memory_space<vmem>>, vector<32x64xbf16>
    %cst_5 = arith.constant dense<0.000000e+00> : vector<32x64xf32>
    %5 = tpu.matmul %3, %4, %cst_5 {dimension_numbers = #tpu.dot_dimension_numbers<[1], [0], [0], [1], [0, 0, 1, 1], [], []>} : vector<32x32xbf16>, vector<32x64xbf16>, vector<32x64xf32> -> vector<32x64xf32>
    %6 = arith.truncf %5 : vector<32x64xf32> to vector<32x64xbf16>
    %7 = vector.shape_cast %6 : vector<32x64xbf16> to vector<2x16x64xbf16>
    %c0_6 = arith.constant 0 : index
    %c0_7 = arith.constant 0 : index
    %c0_8 = arith.constant 0 : index
    %8 = vector.load %arg1[%c0_6, %c0_7, %c0_8] : memref<2x16x64xbf16, #tpu.memory_space<vmem>>, vector<2x16x64xbf16>
    %9 = tpu.concatenate %8, %7 in 2 : vector<2x16x64xbf16>, vector<2x16x64xbf16> -> vector<2x16x128xbf16>
    %cst_9 = arith.constant 0.000000e+00 : bf16
    %10 = vector.broadcast %cst_9 : bf16 to vector<2x2x128xbf16>
    %11 = vector.extract_strided_slice %9 {offsets = [0, 0, 0], sizes = [2, 14, 128], strides = [1, 1, 1]} : vector<2x16x128xbf16> to vector<2x14x128xbf16>
    %12 = tpu.concatenate %10, %11 in 1 : vector<2x2x128xbf16>, vector<2x14x128xbf16> -> vector<2x16x128xbf16>
    %cst_10 = arith.constant 0.000000e+00 : bf16
    %13 = vector.broadcast %cst_10 : bf16 to vector<2x1x128xbf16>
    %14 = vector.extract_strided_slice %9 {offsets = [0, 0, 0], sizes = [2, 15, 128], strides = [1, 1, 1]} : vector<2x16x128xbf16> to vector<2x15x128xbf16>
    %15 = tpu.concatenate %13, %14 in 1 : vector<2x1x128xbf16>, vector<2x15x128xbf16> -> vector<2x16x128xbf16>
    %cst_11 = arith.constant 0.000000e+00 : bf16
    %16 = vector.broadcast %cst_11 : bf16 to vector<2x1x128xbf16>
    %17 = vector.extract_strided_slice %9 {offsets = [0, 1, 0], sizes = [2, 15, 128], strides = [1, 1, 1]} : vector<2x16x128xbf16> to vector<2x15x128xbf16>
    %18 = tpu.concatenate %17, %16 in 1 : vector<2x15x128xbf16>, vector<2x1x128xbf16> -> vector<2x16x128xbf16>
    %cst_12 = arith.constant 0.000000e+00 : bf16
    %19 = vector.broadcast %cst_12 : bf16 to vector<2x2x128xbf16>
    %20 = vector.extract_strided_slice %9 {offsets = [0, 2, 0], sizes = [2, 14, 128], strides = [1, 1, 1]} : vector<2x16x128xbf16> to vector<2x14x128xbf16>
    %21 = tpu.concatenate %20, %19 in 1 : vector<2x14x128xbf16>, vector<2x2x128xbf16> -> vector<2x16x128xbf16>
    %22 = tpu.concatenate %12, %15, %9, %18, %21 in 2 : vector<2x16x128xbf16>, vector<2x16x128xbf16>, vector<2x16x128xbf16>, vector<2x16x128xbf16>, vector<2x16x128xbf16> -> vector<2x16x640xbf16>
    %23 = vector.shape_cast %22 : vector<2x16x640xbf16> to vector<32x640xbf16>
    %c0_13 = arith.constant 0 : index
    %c0_14 = arith.constant 0 : index
    %24 = vector.load %arg4[%c0_13, %c0_14] : memref<640x128xbf16, #tpu.memory_space<vmem>>, vector<640x128xbf16>
    %cst_15 = arith.constant dense<0.000000e+00> : vector<32x128xf32>
    %25 = tpu.matmul %23, %24, %cst_15 {dimension_numbers = #tpu.dot_dimension_numbers<[1], [0], [0], [1], [0, 0, 1, 1], [], []>} : vector<32x640xbf16>, vector<640x128xbf16>, vector<32x128xf32> -> vector<32x128xf32>
    %cst_16 = arith.constant dense<0.000000e+00> : vector<128xf32>
    %26 = vector.multi_reduction <add>, %25, %cst_16 [0] : vector<32x128xf32> to vector<128xf32>
    %27 = vector.shape_cast %26 : vector<128xf32> to vector<1x128xf32>
    %28 = arith.mulf %25, %25 : vector<32x128xf32>
    %cst_17 = arith.constant dense<0.000000e+00> : vector<128xf32>
    %29 = vector.multi_reduction <add>, %28, %cst_17 [0] : vector<32x128xf32> to vector<128xf32>
    %30 = vector.shape_cast %29 : vector<128xf32> to vector<1x128xf32>
    %31 = tpu.concatenate %27, %30 in 0 : vector<1x128xf32>, vector<1x128xf32> -> vector<2x128xf32>
    %c0_18 = arith.constant 0 : index
    %c0_19 = arith.constant 0 : index
    %32 = vector.load %arg7[%c0_18, %c0_19] : memref<128x8xf32, #tpu.memory_space<vmem>>, vector<128x8xf32>
    %cst_20 = arith.constant dense<0.000000e+00> : vector<2x8xf32>
    %33 = tpu.matmul %31, %32, %cst_20 {dimension_numbers = #tpu.dot_dimension_numbers<[1], [0], [0], [1], [0, 0, 1, 1], [], []>} : vector<2x128xf32>, vector<128x8xf32>, vector<2x8xf32> -> vector<2x8xf32>
    %cst_21 = arith.constant 5.120000e+02 : f32
    %34 = vector.broadcast %cst_21 : f32 to vector<2x8xf32>
    %35 = arith.divf %33, %34 : vector<2x8xf32>
    %36 = vector.extract_strided_slice %35 {offsets = [0, 0], sizes = [1, 8], strides = [1, 1]} : vector<2x8xf32> to vector<1x8xf32>
    %37 = vector.extract_strided_slice %35 {offsets = [1, 0], sizes = [1, 8], strides = [1, 1]} : vector<2x8xf32> to vector<1x8xf32>
    %38 = arith.mulf %36, %36 : vector<1x8xf32>
    %39 = arith.subf %37, %38 : vector<1x8xf32>
    %cst_22 = arith.constant 9.99999974E-6 : f32
    %40 = vector.broadcast %cst_22 : f32 to vector<1x8xf32>
    %41 = arith.addf %39, %40 : vector<1x8xf32>
    %42 = math.rsqrt %41 : vector<1x8xf32>
    %c0_23 = arith.constant 0 : index
    %c0_24 = arith.constant 0 : index
    %43 = vector.load %arg5[%c0_23, %c0_24] : memref<1x8xf32, #tpu.memory_space<vmem>>, vector<1x8xf32>
    %44 = arith.mulf %43, %42 : vector<1x8xf32>
    %c0_25 = arith.constant 0 : index
    %c0_26 = arith.constant 0 : index
    %45 = vector.load %arg6[%c0_25, %c0_26] : memref<1x8xf32, #tpu.memory_space<vmem>>, vector<1x8xf32>
    %46 = arith.mulf %36, %44 : vector<1x8xf32>
    %47 = arith.subf %45, %46 : vector<1x8xf32>
    %48 = tpu.concatenate %44, %47 in 0 : vector<1x8xf32>, vector<1x8xf32> -> vector<2x8xf32>
    %c0_27 = arith.constant 0 : index
    %c0_28 = arith.constant 0 : index
    %49 = vector.load %arg8[%c0_27, %c0_28] : memref<8x128xf32, #tpu.memory_space<vmem>>, vector<8x128xf32>
    %cst_29 = arith.constant dense<0.000000e+00> : vector<2x128xf32>
    %50 = tpu.matmul %48, %49, %cst_29 {dimension_numbers = #tpu.dot_dimension_numbers<[1], [0], [0], [1], [0, 0, 1, 1], [], []>} : vector<2x8xf32>, vector<8x128xf32>, vector<2x128xf32> -> vector<2x128xf32>
    %51 = vector.extract_strided_slice %50 {offsets = [0, 0], sizes = [1, 128], strides = [1, 1]} : vector<2x128xf32> to vector<1x128xf32>
    %52 = vector.broadcast %51 : vector<1x128xf32> to vector<32x128xf32>
    %53 = arith.mulf %25, %52 : vector<32x128xf32>
    %54 = vector.extract_strided_slice %50 {offsets = [1, 0], sizes = [1, 128], strides = [1, 1]} : vector<2x128xf32> to vector<1x128xf32>
    %55 = vector.broadcast %54 : vector<1x128xf32> to vector<32x128xf32>
    %56 = arith.addf %53, %55 : vector<32x128xf32>
    %cst_30 = arith.constant 0.000000e+00 : f32
    %57 = vector.broadcast %cst_30 : f32 to vector<32x128xf32>
    %58 = arith.maximumf %56, %57 : vector<32x128xf32>
    %59 = arith.truncf %58 : vector<32x128xf32> to vector<32x128xbf16>
    %60 = vector.shape_cast %59 : vector<32x128xbf16> to vector<2x16x128xbf16>
    %cst_31 = arith.constant 0.000000e+00 : bf16
    %61 = vector.broadcast %cst_31 : bf16 to vector<2x2x128xbf16>
    %62 = vector.extract_strided_slice %60 {offsets = [0, 0, 0], sizes = [2, 14, 128], strides = [1, 1, 1]} : vector<2x16x128xbf16> to vector<2x14x128xbf16>
    %63 = tpu.concatenate %61, %62 in 1 : vector<2x2x128xbf16>, vector<2x14x128xbf16> -> vector<2x16x128xbf16>
    %cst_32 = arith.constant 0.000000e+00 : bf16
    %64 = vector.broadcast %cst_32 : bf16 to vector<2x1x128xbf16>
    %65 = vector.extract_strided_slice %60 {offsets = [0, 0, 0], sizes = [2, 15, 128], strides = [1, 1, 1]} : vector<2x16x128xbf16> to vector<2x15x128xbf16>
    %66 = tpu.concatenate %64, %65 in 1 : vector<2x1x128xbf16>, vector<2x15x128xbf16> -> vector<2x16x128xbf16>
    %cst_33 = arith.constant 0.000000e+00 : bf16
    %67 = vector.broadcast %cst_33 : bf16 to vector<2x1x128xbf16>
    %68 = vector.extract_strided_slice %60 {offsets = [0, 1, 0], sizes = [2, 15, 128], strides = [1, 1, 1]} : vector<2x16x128xbf16> to vector<2x15x128xbf16>
    %69 = tpu.concatenate %68, %67 in 1 : vector<2x15x128xbf16>, vector<2x1x128xbf16> -> vector<2x16x128xbf16>
    %cst_34 = arith.constant 0.000000e+00 : bf16
    %70 = vector.broadcast %cst_34 : bf16 to vector<2x2x128xbf16>
    %71 = vector.extract_strided_slice %60 {offsets = [0, 2, 0], sizes = [2, 14, 128], strides = [1, 1, 1]} : vector<2x16x128xbf16> to vector<2x14x128xbf16>
    %72 = tpu.concatenate %71, %70 in 1 : vector<2x14x128xbf16>, vector<2x2x128xbf16> -> vector<2x16x128xbf16>
    %73 = tpu.concatenate %63, %66, %60, %69, %72 in 2 : vector<2x16x128xbf16>, vector<2x16x128xbf16>, vector<2x16x128xbf16>, vector<2x16x128xbf16>, vector<2x16x128xbf16> -> vector<2x16x640xbf16>
    %74 = vector.shape_cast %73 : vector<2x16x640xbf16> to vector<32x640xbf16>
    %c0_35 = arith.constant 0 : index
    %c0_36 = arith.constant 0 : index
    %75 = vector.load %arg9[%c0_35, %c0_36] : memref<640x256xbf16, #tpu.memory_space<vmem>>, vector<640x256xbf16>
    %cst_37 = arith.constant dense<0.000000e+00> : vector<32x256xf32>
    %76 = tpu.matmul %74, %75, %cst_37 {dimension_numbers = #tpu.dot_dimension_numbers<[1], [0], [0], [1], [0, 0, 1, 1], [], []>} : vector<32x640xbf16>, vector<640x256xbf16>, vector<32x256xf32> -> vector<32x256xf32>
    %cst_38 = arith.constant dense<0.000000e+00> : vector<256xf32>
    %77 = vector.multi_reduction <add>, %76, %cst_38 [0] : vector<32x256xf32> to vector<256xf32>
    %78 = vector.shape_cast %77 : vector<256xf32> to vector<1x256xf32>
    %79 = arith.mulf %76, %76 : vector<32x256xf32>
    %cst_39 = arith.constant dense<0.000000e+00> : vector<256xf32>
    %80 = vector.multi_reduction <add>, %79, %cst_39 [0] : vector<32x256xf32> to vector<256xf32>
    %81 = vector.shape_cast %80 : vector<256xf32> to vector<1x256xf32>
    %82 = tpu.concatenate %78, %81 in 0 : vector<1x256xf32>, vector<1x256xf32> -> vector<2x256xf32>
    %c0_40 = arith.constant 0 : index
    %c0_41 = arith.constant 0 : index
    %83 = vector.load %arg12[%c0_40, %c0_41] : memref<256x16xf32, #tpu.memory_space<vmem>>, vector<256x16xf32>
    %cst_42 = arith.constant dense<0.000000e+00> : vector<2x16xf32>
    %84 = tpu.matmul %82, %83, %cst_42 {dimension_numbers = #tpu.dot_dimension_numbers<[1], [0], [0], [1], [0, 0, 1, 1], [], []>} : vector<2x256xf32>, vector<256x16xf32>, vector<2x16xf32> -> vector<2x16xf32>
    %cst_43 = arith.constant 5.120000e+02 : f32
    %85 = vector.broadcast %cst_43 : f32 to vector<2x16xf32>
    %86 = arith.divf %84, %85 : vector<2x16xf32>
    %87 = vector.extract_strided_slice %86 {offsets = [0, 0], sizes = [1, 16], strides = [1, 1]} : vector<2x16xf32> to vector<1x16xf32>
    %88 = vector.extract_strided_slice %86 {offsets = [1, 0], sizes = [1, 16], strides = [1, 1]} : vector<2x16xf32> to vector<1x16xf32>
    %89 = arith.mulf %87, %87 : vector<1x16xf32>
    %90 = arith.subf %88, %89 : vector<1x16xf32>
    %cst_44 = arith.constant 9.99999974E-6 : f32
    %91 = vector.broadcast %cst_44 : f32 to vector<1x16xf32>
    %92 = arith.addf %90, %91 : vector<1x16xf32>
    %93 = math.rsqrt %92 : vector<1x16xf32>
    %c0_45 = arith.constant 0 : index
    %c0_46 = arith.constant 0 : index
    %94 = vector.load %arg10[%c0_45, %c0_46] : memref<1x16xf32, #tpu.memory_space<vmem>>, vector<1x16xf32>
    %95 = arith.mulf %94, %93 : vector<1x16xf32>
    %c0_47 = arith.constant 0 : index
    %c0_48 = arith.constant 0 : index
    %96 = vector.load %arg11[%c0_47, %c0_48] : memref<1x16xf32, #tpu.memory_space<vmem>>, vector<1x16xf32>
    %97 = arith.mulf %87, %95 : vector<1x16xf32>
    %98 = arith.subf %96, %97 : vector<1x16xf32>
    %99 = tpu.concatenate %95, %98 in 0 : vector<1x16xf32>, vector<1x16xf32> -> vector<2x16xf32>
    %c0_49 = arith.constant 0 : index
    %c0_50 = arith.constant 0 : index
    %100 = vector.load %arg13[%c0_49, %c0_50] : memref<16x256xf32, #tpu.memory_space<vmem>>, vector<16x256xf32>
    %cst_51 = arith.constant dense<0.000000e+00> : vector<2x256xf32>
    %101 = tpu.matmul %99, %100, %cst_51 {dimension_numbers = #tpu.dot_dimension_numbers<[1], [0], [0], [1], [0, 0, 1, 1], [], []>} : vector<2x16xf32>, vector<16x256xf32>, vector<2x256xf32> -> vector<2x256xf32>
    %102 = vector.extract_strided_slice %101 {offsets = [0, 0], sizes = [1, 256], strides = [1, 1]} : vector<2x256xf32> to vector<1x256xf32>
    %103 = vector.broadcast %102 : vector<1x256xf32> to vector<32x256xf32>
    %104 = arith.mulf %76, %103 : vector<32x256xf32>
    %105 = vector.extract_strided_slice %101 {offsets = [1, 0], sizes = [1, 256], strides = [1, 1]} : vector<2x256xf32> to vector<1x256xf32>
    %106 = vector.broadcast %105 : vector<1x256xf32> to vector<32x256xf32>
    %107 = arith.addf %104, %106 : vector<32x256xf32>
    %cst_52 = arith.constant 0.000000e+00 : f32
    %108 = vector.broadcast %cst_52 : f32 to vector<32x256xf32>
    %109 = arith.maximumf %107, %108 : vector<32x256xf32>
    %c0_53 = arith.constant 0 : index
    %c0_54 = arith.constant 0 : index
    %110 = vector.load %arg14[%c0_53, %c0_54] : memref<32x256xf32, #tpu.memory_space<vmem>>, vector<32x256xf32>
    tpu.vector_store %arg14[%c0_53, %c0_54], %109 {strides = array<i32>} : memref<32x256xf32, #tpu.memory_space<vmem>>, vector<32x256xf32>,
    return
  }
}

</mosaic_0001>

<bundles_post_ra>
// kernel: _up_forward.1
= control target key start
LH: loop header
LB: loop body
LE: loop exit
PB: predicated region body
PF: predicated region fallthrough
CT: control target
= control target key end

     0   :  { %vm70_vm0 = vcmask 130048   ;;  %vm114_vm1 = vcmask 261120   ;;  %s2415_s23 = smov 64   ;;  %vm172_vm2 = vcmask 523264   ;;  %vm185_vm3 = vcmask 1040384   ;;  %s3488_s0 = inlined_call_operand.vmem [shape: bf16[16,32], index: 0, kind: input, shape index: {}]   ;;  %s3489_s2 = inlined_call_operand.vmem [shape: bf16[32,16], index: 2, kind: input, shape index: {}]   ;;  %s3490_s3 = inlined_call_operand.vmem [shape: bf16[32,64], index: 3, kind: input, shape index: {}]   ;;  %s3491_s4 = inlined_call_operand.vmem [shape: bf16[640,128], index: 4, kind: input, shape index: {}]   ;;  %s3492_s1 = inlined_call_operand.vmem [shape: bf16[2,16,64], index: 1, kind: input, shape index: {}]   ;;  %s3493_s7 = inlined_call_operand.vmem [shape: f32[128,8], index: 7, kind: input, shape index: {}]   ;;  %s3494_s8 = inlined_call_operand.vmem [shape: f32[8,128], index: 8, kind: input, shape index: {}]   ;;  %s3495_s9 = inlined_call_operand.vmem [shape: bf16[640,256], index: 9, kind: input, shape index: {}]   ;;  %s3496_s5 = inlined_call_operand.vmem [shape: f32[1,8], index: 5, kind: input, shape index: {}]   ;;  %s3497_s6 = inlined_call_operand.vmem [shape: f32[1,8], index: 6, kind: input, shape index: {}]   ;;  %s3498_s12 = inlined_call_operand.vmem [shape: f32[256,16], index: 12, kind: input, shape index: {}]   ;;  %s3499_s13 = inlined_call_operand.vmem [shape: f32[16,256], index: 13, kind: input, shape index: {}]   ;;  %s3500_s10 = inlined_call_operand.vmem [shape: f32[1,16], index: 10, kind: input, shape index: {}]   ;;  %s3501_s11 = inlined_call_operand.vmem [shape: f32[1,16], index: 11, kind: input, shape index: {}]   ;;  %s3502_s14 = inlined_call_operand.vmem [shape: f32[32,256], index: 14, kind: output, shape index: {}]  }
   0x1   :  { %v2282_v0 = vld [vmem:[%s3488_s0] sm:$0xff]  ;;  %v2281_v2 = vld [vmem:[%s3489_s2 + $0x8] sm:$0xff]  ;;  %v2310_v11 = vld [vmem:[%s3491_s4 + $0xb8] sm:$0xff]  ;;  %vm208_vm5 = vsmask.f32 256  ;;  %vm218_vm6 = vcmask 1047552  }
   0x2   :  { %v2280_v1 = vld [vmem:[%s3489_s2] sm:$0xff]  ;;  %84 = vmatpush.bf16.msra.mxu0 %v2282_v0  ;;  %v2284_v3 = vld [vmem:[%s3490_s3 + $0x8] sm:$0xff]  ;;  %v2294_v12 = vld [vmem:[%s3491_s4 + $0x38] sm:$0xff]  ;;  %vm219_vm7 = vsmask.f32 7424  ;;  %vm225_vm10 = vcmask 1046528  }
   0x3   :  { %127 = vmatpush.bf16.msra.mxu1 %v2284_v3  ;;  %v2283_v4 = vld [vmem:[%s3490_s3] sm:$0xff]  ;;  %v2302_v14 = vld [vmem:[%s3491_s4 + $0x78] sm:$0xff]  ;;  %552 = vmatpush.bf16.msra.mxu2 %v2294_v12  ;;  %v2309_v16 = vld [vmem:[%s3491_s4 + $0xb0] sm:$0xff]  ;;  %vm745_vm15 = vcmask 64512  }
   0x4   :  { %v2318_v15 = vld [vmem:[%s3491_s4 + $0xf8] sm:$0xff]  ;;  %v2293_v17 = vld [vmem:[%s3491_s4 + $0x30] sm:$0xff]  ;;  %571 = vmatpush.bf16.msra.mxu3 %v2302_v14  ;;  %v2308_v20 = vld [vmem:[%s3491_s4 + $0xa8] sm:$0xff] }
   0x5   :  { %1759 = vmatmul.msk.bf16.vlgmr.msra.gmra.mxu0 %vm70_vm0, %v2280_v1  ;;  %v2301_v18 = vld [vmem:[%s3491_s4 + $0x70] sm:$0xff]  ;;  %v2292_v21 = vld [vmem:[%s3491_s4 + $0x28] sm:$0xff]  ;;  %v2307_v27 = vld [vmem:[%s3491_s4 + $0xa0] sm:$0xff] }
   0x6   :  { %590 = vmatpush.bf16.msrb.mxu0 %v2310_v11  ;;  %v2317_v19 = vld [vmem:[%s3491_s4 + $0xf0] sm:$0xff]  ;;  %v2300_v22 = vld [vmem:[%s3491_s4 + $0x68] sm:$0xff]  ;;  %v2291_v28 = vld [vmem:[%s3491_s4 + $0x20] sm:$0xff] }
   0x7   :  { %128 = vmatpush.bf16.msra.mxu1 %v2283_v4  ;;  %553 = vmatpush.bf16.msra.mxu2 %v2293_v17  ;;  %v2316_v23 = vld [vmem:[%s3491_s4 + $0xe8] sm:$0xff]  ;;  %v2299_v29 = vld [vmem:[%s3491_s4 + $0x60] sm:$0xff]  ;;  %v2306_v34 = vld [vmem:[%s3491_s4 + $0x98] sm:$0xff] }
   0x8   :  { %572 = vmatpush.bf16.msra.mxu3 %v2301_v18  ;;  %v2315_v30 = vld [vmem:[%s3491_s4 + $0xe0] sm:$0xff]  ;;  %v2290_v35 = vld [vmem:[%s3491_s4 + $0x18] sm:$0xff]  ;;  %v2305_v39 = vld [vmem:[%s3491_s4 + $0x90] sm:$0xff] }
   0x9   :  { %v2298_v36 = vld [vmem:[%s3491_s4 + $0x58] sm:$0xff]  ;;  %v2289_v40 = vld [vmem:[%s3491_s4 + $0x10] sm:$0xff]  ;;  %v2304_v43 = vld [vmem:[%s3491_s4 + $0x88] sm:$0xff] }
   0xa   :  { %591 = vmatpush.bf16.msrb.mxu0 %v2309_v16  ;;  %v2314_v37 = vld [vmem:[%s3491_s4 + $0xd8] sm:$0xff]  ;;  %v2297_v41 = vld [vmem:[%s3491_s4 + $0x50] sm:$0xff]  ;;  %v2288_v44 = vld [vmem:[%s3491_s4 + $0x8] sm:$0xff] }
   0xb   :  { %609 = vmatpush.bf16.msrb.mxu1 %v2318_v15  ;;  %554 = vmatpush.bf16.msra.mxu2 %v2292_v21  ;;  %v2313_v42 = vld [vmem:[%s3491_s4 + $0xd0] sm:$0xff]  ;;  %v2303_v48 = vld [vmem:[%s3491_s4 + $0x80] sm:$0xff]  ;;  %v2296_v53 = vld [vmem:[%s3491_s4 + $0x48] sm:$0xff] }
   0xc   :  { %573 = vmatpush.bf16.msra.mxu3 %v2300_v22  ;;  %v2287_v52 = vld [vmem:[%s3491_s4] sm:$0xff]  ;;  %v2312_v54 = vld [vmem:[%s3491_s4 + $0xc8] sm:$0xff]  ;;  %v2326_v55 = vld [vmem:[%s3491_s4 + $0x138] sm:$0xff] }
   0xd   :  { %v2295_v56 = vld [vmem:[%s3491_s4 + $0x40] sm:$0xff]  ;;  %v2325_v58 = vld [vmem:[%s3491_s4 + $0x130] sm:$0xff]  ;;  %v2324_v59 = vld [vmem:[%s3491_s4 + $0x128] sm:$0xff] }
   0xe   :  { %592 = vmatpush.bf16.msrb.mxu0 %v2308_v20  ;;  %v2311_v57 = vld [vmem:[%s3491_s4 + $0xc0] sm:$0xff]  ;;  %v2322_v61 = vld [vmem:[%s3491_s4 + $0x118] sm:$0xff]  ;;  %v2321_v62 = vld [vmem:[%s3491_s4 + $0x110] sm:$0xff] }
   0xf   :  { %610 = vmatpush.bf16.msrb.mxu1 %v2317_v19  ;;  %555 = vmatpush.bf16.msra.mxu2 %v2291_v28  ;;  %v2323_v60 = vld [vmem:[%s3491_s4 + $0x120] sm:$0xff]  ;;  %v2320_v63 = vld [vmem:[%s3491_s4 + $0x108] sm:$0xff]  ;;  %vm2634_vm4 = vmneg %vm185_vm3 }
  0x10   :  { %574 = vmatpush.bf16.msra.mxu3 %v2299_v29  ;;  %v2285_v0 = vld [vmem:[%s3492_s1] sm:$0xff]  ;;  %vm2641_vm8 = vmand %vm185_vm3, %vm208_vm5  ;;  %v2286_v16 = vld [vmem:[%s3492_s1 + $0x8] sm:$0xff] }
  0x11   :  { %v2319_v1 = vld [vmem:[%s3491_s4 + $0x100] sm:$0xff]  ;;  %vm2645_vm9 = vmand %vm218_vm6, %vm219_vm7  ;;  %v2222_v11 = vld [vmem:[%s3495_s9 + $0x228] sm:$0xf0] }
  0x12   :  { %593 = vmatpush.bf16.msrb.mxu0 %v2307_v27  ;;  %v1571_v4 = vld [vmem:[%s3498_s12 + $0x70] sm:$0xff] }
  0x13   :  { %611 = vmatpush.bf16.msrb.mxu1 %v2316_v23  ;;  %556 = vmatpush.bf16.msra.mxu2 %v2290_v35 }
  0x14   :  { %575 = vmatpush.bf16.msra.mxu3 %v2298_v36  ;;  %v683_v36 = vld [vmem:[%s3493_s7 + $0x68] sm:$0xff] }
  0x15   :  { %1760 = vmatmul.msk.bf16.gmra.mxu0 %vm70_vm0, %v2281_v2 }
  0x16   :  { %594 = vmatpush.bf16.msrb.mxu0 %v2306_v34 }
  0x17   :  { %612 = vmatpush.bf16.msrb.mxu1 %v2315_v30  ;;  %557 = vmatpush.bf16.msra.mxu2 %v2289_v40  ;;  %v680_v40 = vld [vmem:[%s3493_s7 + $0x50] sm:$0xff] }
  0x18   :  { %576 = vmatpush.bf16.msra.mxu3 %v2297_v41 }
  0x1a   :  { %595 = vmatpush.bf16.msrb.mxu0 %v2305_v39  ;;  %v681_v39 = vld [vmem:[%s3493_s7 + $0x58] sm:$0xff] }
  0x1b   :  { %613 = vmatpush.bf16.msrb.mxu1 %v2314_v37  ;;  %558 = vmatpush.bf16.msra.mxu2 %v2288_v44  ;;  %v682_v37 = vld [vmem:[%s3493_s7 + $0x60] sm:$0xff]  ;;  %v679_v44 = vld [vmem:[%s3493_s7 + $0x48] sm:$0xff] }
  0x1c   :  { %577 = vmatpush.bf16.msra.mxu3 %v2296_v53 }
  0x1e   :  { %596 = vmatpush.bf16.msrb.mxu0 %v2304_v43 }
  0x1f   :  { %614 = vmatpush.bf16.msrb.mxu1 %v2313_v42  ;;  %559 = vmatpush.bf16.msra.mxu2 %v2287_v52 }
  0x20   :  { %578 = vmatpush.bf16.msra.mxu3 %v2295_v56  ;;  %v671_v56 = vld [vmem:[%s3493_s7 + $0x8] sm:$0xff] }
  0x22   :  { %597 = vmatpush.bf16.msrb.mxu0 %v2303_v48  ;;  %v676_v48 = vld [vmem:[%s3493_s7 + $0x30] sm:$0xff] }
  0x23   :  { %615 = vmatpush.bf16.msrb.mxu1 %v2312_v54  ;;  %628 = vmatpush.bf16.msrb.mxu2 %v2326_v55  ;;  %v673_v54 = vld [vmem:[%s3493_s7 + $0x18] sm:$0xff]  ;;  %v672_v55 = vld [vmem:[%s3493_s7 + $0x10] sm:$0xff] }
  0x27   :  { %616 = vmatpush.bf16.msrb.mxu1 %v2311_v57  ;;  %629 = vmatpush.bf16.msrb.mxu2 %v2325_v58 }
  0x2b   :  { %630 = vmatpush.bf16.msrb.mxu2 %v2324_v59 }
  0x2f   :  { %631 = vmatpush.bf16.msrb.mxu2 %v2323_v60  ;;  %v670_v60 = vld [vmem:[%s3493_s7] sm:$0xff] }
  0x33   :  { %632 = vmatpush.bf16.msrb.mxu2 %v2322_v61 }
  0x37   :  { %633 = vmatpush.bf16.msrb.mxu2 %v2321_v62 }
  0x3b   :  { %634 = vmatpush.bf16.msrb.mxu2 %v2320_v63 }
  0x3f   :  { %635 = vmatpush.bf16.msrb.mxu2 %v2319_v1 }
  0x82   :  { %v86_v5 = vpop.f32.mrf.mxu0 }
  0x8a   :  { %v88_v6 = vpop.f32.mrf.mxu0 }
  0x8b   :  { %v96_v7 = vpack.c.bf16 %v88_v6, %v86_v5 }
  0x8d   :  { %1769 = vmatmul.msk.bf16.vlgmr.msra.gmra.mxu1 %vm114_vm1, %v96_v7 }
  0x92   :  { %v91_v8 = vpop.f32.mrf.mxu0 }
  0x9a   :  { %v93_v9 = vpop.f32.mrf.mxu0 }
  0x9b   :  { %v97_v10 = vpack.c.bf16 %v93_v9, %v91_v8 }
  0x9d   :  { %1770 = vmatmul.msk.bf16.gmra.mxu1 %vm114_vm1, %v97_v10 }
 0x10a   :  { %v130_v13 = vpop.f32.mrf.mxu1 }
 0x10b   :  { %v140_v24 = vpack.c.bf16 %v130_v13, %v130_v13 }
 0x10d   :  { %v162_v31 = vunpack.c.l.b16 %v140_v24 }
 0x112   :  { %v132_v25 = vpop.f32.mrf.mxu1 }
 0x113   :  { %v141_v26 = vpack.c.bf16 %v132_v25, %v132_v25 }
 0x115   :  { %v163_v32 = vunpack.c.l.b16 %v141_v26 }
 0x117   :  { %v166_v33 = vpack.c.b16 %v163_v32, %v162_v31  ;;  %v685_v32 = vld [vmem:[%s3493_s7 + $0x78] sm:$0xff] }
 0x118   :  { %686 = vmatpush.msrb.mxu3 %v685_v32 }
 0x119   :  { %168 = vrot.lane.b32.xlu0 %v166_v33, %s2415_s23  ;;  %v684_v33 = vld [vmem:[%s3493_s7 + $0x70] sm:$0xff] }
 0x11a   :  { %v135_v38 = vpop.f32.mrf.mxu1  ;;  %687 = vmatpush.msrb.mxu3 %v684_v33 }
 0x11b   :  { %v142_v45 = vpack.c.bf16 %v135_v38, %v135_v38 }
 0x11c   :  { %688 = vmatpush.msrb.mxu3 %v683_v36 }
 0x11d   :  { %v164_v49 = vunpack.c.l.b16 %v142_v45  ;;  %v678_v45 = vld [vmem:[%s3493_s7 + $0x40] sm:$0xff] }
 0x11e   :  { %689 = vmatpush.msrb.mxu3 %v682_v37 }
 0x120   :  { %690 = vmatpush.msrb.mxu3 %v681_v39 }
 0x122   :  { %v137_v46 = vpop.f32.mrf.mxu1  ;;  %691 = vmatpush.msrb.mxu3 %v680_v40 }
 0x123   :  { %v143_v47 = vpack.c.bf16 %v137_v46, %v137_v46  ;;  %v677_v46 = vld [vmem:[%s3493_s7 + $0x38] sm:$0xff] }
 0x124   :  { %692 = vmatpush.msrb.mxu3 %v679_v44  ;;  %v2416_v44 = vmov 512.0  }
 0x125   :  { %v165_v50 = vunpack.c.l.b16 %v143_v47  ;;  %2409 = vrcp.f32 %v2416_v44 }
 0x126   :  { %693 = vmatpush.msrb.mxu3 %v678_v45 }
 0x127   :  { %v167_v51 = vpack.c.b16 %v165_v50, %v164_v49  ;;  %v675_v50 = vld [vmem:[%s3493_s7 + $0x28] sm:$0xff] }
 0x128   :  { %694 = vmatpush.msrb.mxu3 %v677_v46 }
 0x129   :  { %170 = vrot.lane.b32.xlu0 %v167_v51, %s2415_s23  ;;  %v674_v51 = vld [vmem:[%s3493_s7 + $0x20] sm:$0xff] }
 0x12a   :  { %695 = vmatpush.msrb.mxu3 %v676_v48 }
 0x12b   :  { %v2410_v45 = vpop.eup %2409 }
 0x12c   :  { %696 = vmatpush.msrb.mxu3 %v675_v50  ;;  %v707_v46 = vmul.f32 512.0, %v2410_v45  ;;  %vm711_vm11 = vweird.f32 %v2410_v45 }
 0x12e   :  { %697 = vmatpush.msrb.mxu3 %v674_v51 }
 0x130   :  { %698 = vmatpush.msrb.mxu3 %v673_v54 }
 0x132   :  { %699 = vmatpush.msrb.mxu3 %v672_v55 }
 0x134   :  { %700 = vmatpush.msrb.mxu3 %v671_v56 }
 0x136   :  { %701 = vmatpush.msrb.mxu3 %v670_v60  ;;  %v2004_v60 = vld [vmem:[%s3495_s9 + $0x70] sm:$0xf] }
 0x18b   :  { %v169_v2 = vpop.permute.xlu0 %168 }
 0x18c   :  { %v175_v3 = vsel %vm172_vm2, %v2285_v0, %v169_v2 }
 0x18d   :  { %598 = vmatmul.bf16.vlgmr.msrb.gmra.mxu0 %v175_v3  ;;  %v183_v5 = vrot.slane %v175_v3, 7  ;;  %v193_v6 = vshrl.u32 %v175_v3, 16  ;;  %v196_v7 = vshll.u32 %v175_v3, 16  ;;  %v223_v28 = vrot.slane %v175_v3, 1 }
 0x18f   :  { %1940 = vmatmul.msk.bf16.vlgmr.msra.gmra.mxu2 %vm2634_vm4, %v183_v5  ;;  %v195_v8 = vrot.slane %v193_v6, 7  ;;  %v212_v10 = vrot.slane %v196_v7, 1 }
 0x191   :  { %v198_v12 = vor.u32 %v196_v7, %v195_v8  ;;  %v213_v13 = vor.u32 %v212_v10, %v193_v6 }
 0x193   :  { %v210_v14 = vsel %vm2641_vm8, 0, %v198_v12  ;;  %v221_v15 = vsel %vm2645_vm9, %v213_v13, 0 }
 0x194   :  { %579 = vmatmul.bf16.vlgmr.msra.gmra.mxu3 %v210_v14  ;;  %617 = vmatmul.bf16.vlgmr.msrb.gmra.mxu1 %v221_v15 }
 0x19b   :  { %v171_v17 = vpop.permute.xlu0 %170 }
 0x19c   :  { %v179_v18 = vsel %vm172_vm2, %v2286_v16, %v171_v17 }
 0x19d   :  { %603 = vmatmul.bf16.gmra.mxu0 %v179_v18  ;;  %v184_v19 = vrot.slane %v179_v18, 7  ;;  %v199_v20 = vshrl.u32 %v179_v18, 16  ;;  %v202_v21 = vshll.u32 %v179_v18, 16  ;;  %v224_v29 = vrot.slane %v179_v18, 1 }
 0x19f   :  { %1942 = vmatmul.msk.bf16.gmra.mxu2 %vm2634_vm4, %v184_v19  ;;  %v201_v22 = vrot.slane %v199_v20, 7  ;;  %v214_v23 = vrot.slane %v202_v21, 1 }
 0x1a1   :  { %v204_v24 = vor.u32 %v202_v21, %v201_v22  ;;  %v215_v25 = vor.u32 %v214_v23, %v199_v20 }
 0x1a3   :  { %v211_v26 = vsel %vm2641_vm8, 0, %v204_v24  ;;  %v222_v27 = vsel %vm2645_vm9, %v215_v25, 0 }
 0x1a4   :  { %584 = vmatmul.bf16.gmra.mxu3 %v211_v26  ;;  %622 = vmatmul.bf16.gmra.mxu1 %v222_v27 }
 0x1af   :  { %1943 = vmatmul.msk.bf16.vlgmr.msrb.gmra.mxu2 %vm225_vm10, %v223_v28 }
 0x1bf   :  { %1944 = vmatmul.msk.bf16.gmra.mxu2 %vm225_vm10, %v224_v29 }
 0x20a   :  { %v599_v38 = vpop.f32.mrf.mxu0 }
 0x211   :  { %v618_v41 = vpop.f32.mrf.mxu1 }
 0x212   :  { %v561_v30 = vpop.f32.mrf.mxu2  ;;  %v601_v47 = vpop.f32.mrf.mxu0 }
 0x217   :  { %v580_v34 = vpop.f32.mrf.mxu3 }
 0x218   :  { %v581_v61 = vadd.f32 %v580_v34, %v561_v30 }
 0x219   :  { %v620_v52 = vpop.f32.mrf.mxu1 }
 0x21a   :  { %v563_v31 = vpop.f32.mrf.mxu2  ;;  %v604_v58 = vpop.f32.mrf.mxu0  ;;  %v600_v2 = vadd.f32 %v599_v38, %v581_v61 }
 0x21c   :  { %v619_v8 = vadd.f32 %v618_v41, %v600_v2  ;;  %v1996_v2 = vld [vmem:[%s3495_s9 + $0x60] sm:$0xf] }
 0x21f   :  { %v582_v42 = vpop.f32.mrf.mxu3 }
 0x220   :  { %v583_v57 = vadd.f32 %v582_v42, %v563_v31 }
 0x221   :  { %v623_v0 = vpop.f32.mrf.mxu1 }
 0x222   :  { %v566_v35 = vpop.f32.mrf.mxu2  ;;  %v602_v63 = vadd.f32 %v601_v47, %v583_v57  ;;  %v606_v13 = vpop.f32.mrf.mxu0  ;;  %v708_v47 = vsub.f32 1.0, %v707_v46  ;;  %v744_v57 = vld [vmem:[%s3494_s8] sm:$0xff] }
 0x223   :  { %764 = vmatpush.msra.mxu0 %v744_v57 }
 0x224   :  { %v621_v6 = vadd.f32 %v620_v52, %v602_v63  ;;  %v709_v48 = vmul.f32 %v2410_v45, %v708_v47  ;;  %v2124_v63 = vld [vmem:[%s3495_s9 + $0x160] sm:$0xf] }
 0x227   :  { %v585_v53 = vpop.f32.mrf.mxu3 }
 0x228   :  { %v586_v62 = vadd.f32 %v585_v53, %v566_v35 }
 0x229   :  { %v625_v18 = vpop.f32.mrf.mxu1 }
 0x22a   :  { %v568_v43 = vpop.f32.mrf.mxu2  ;;  %v605_v3 = vadd.f32 %v604_v58, %v586_v62  ;;  %v2132_v58 = vld [vmem:[%s3495_s9 + $0x170] sm:$0xf]  ;;  %v2342_v62 = vld [vmem:[%s3495_s9 + $0x74] sm:$0xf0] }
 0x22c   :  { %v624_v12 = vadd.f32 %v623_v0, %v605_v3  ;;  %v2372_v0 = vld [vmem:[%s3495_s9 + $0x164] sm:$0xf0] }
 0x22d   :  { %v2340_v3 = vld [vmem:[%s3495_s9 + $0x64] sm:$0xf0] }
 0x22f   :  { %v587_v1 = vpop.f32.mrf.mxu3 }
 0x230   :  { %v588_v5 = vadd.f32 %v587_v1, %v568_v43  ;;  %v2005_v1 = vor.u32 %v2342_v62, %v2004_v60  ;;  %v2100_v60 = vld [vmem:[%s3495_s9 + $0x130] sm:$0xf] }
 0x232   :  { %v637_v49 = vpop.f32.mrf.mxu2  ;;  %v607_v14 = vadd.f32 %v606_v13, %v588_v5  ;;  %v2068_v5 = vld [vmem:[%s3495_s9 + $0xf0] sm:$0xf]  ;;  %v2390_v13 = vld [vmem:[%s3495_s9 + $0x1f4] sm:$0xf0]  ;;  %1321 = vmatpush.bf16.msra.mxu1 %v2005_v1  ;;  %v2044_v1 = vld [vmem:[%s3495_s9 + $0xc0] sm:$0xf] }
 0x233   :  { %v2715_v15 = vadd.f32 %v637_v49, %v619_v8  ;;  %v710_v49 = vadd.f32 %v2410_v45, %v709_v48  ;;  %v2358_v8 = vld [vmem:[%s3495_s9 + $0xf4] sm:$0xf0] }
 0x234   :  { %v626_v22 = vadd.f32 %v625_v18, %v607_v14  ;;  %v2069_v18 = vor.u32 %v2358_v8, %v2068_v5  ;;  %v2364_v8 = vld [vmem:[%s3495_s9 + $0x124] sm:$0xf0] }
 0x235   :  { %v656_v19 = vmul.f32 %v2715_v15, %v2715_v15  ;;  %v2734_v50 = vsel %vm711_vm11, %v2410_v45, %v710_v49 }
 0x236   :  { %1340 = vmatpush.bf16.msra.mxu2 %v2069_v18 }
 0x23a   :  { %v639_v59 = vpop.f32.mrf.mxu2 }
 0x23b   :  { %v2713_v10 = vadd.f32 %v639_v59, %v621_v6  ;;  %v2374_v59 = vld [vmem:[%s3495_s9 + $0x174] sm:$0xf0] }
 0x23c   :  { %v2133_v61 = vor.u32 %v2374_v59, %v2132_v58 }
 0x23d   :  { %v657_v17 = vmul.f32 %v2713_v10, %v2713_v10  ;;  %v647_v20 = vadd.f32 %v2713_v10, %v2715_v15 }
 0x23e   :  { %1359 = vmatpush.bf16.msra.mxu3 %v2133_v61  ;;  %v2366_v61 = vld [vmem:[%s3495_s9 + $0x134] sm:$0xf0] }
 0x23f   :  { %v660_v24 = vadd.f32 %v657_v17, %v656_v19  ;;  %v1997_v17 = vor.u32 %v2340_v3, %v1996_v2  ;;  %v2101_v62 = vor.u32 %v2366_v61, %v2100_v60  ;;  %v2352_v2 = vld [vmem:[%s3495_s9 + $0xc4] sm:$0xf0]  ;;  %v2172_v3 = vld [vmem:[%s3495_s9 + $0x1c0] sm:$0xf] }
 0x240   :  { %v2045_v5 = vor.u32 %v2352_v2, %v2044_v1  ;;  %v2140_v60 = vld [vmem:[%s3495_s9 + $0x180] sm:$0xf] }
 0x241   :  { %1322 = vmatpush.bf16.msra.mxu1 %v1997_v17  ;;  %v2332_v17 = vld [vmem:[%s3495_s9 + $0x24] sm:$0xf0]  ;;  %v2252_v2 = vld [vmem:[%s3495_s9 + $0x260] sm:$0xf] }
 0x242   :  { %v642_v7 = vpop.f32.mrf.mxu2 }
 0x243   :  { %v2717_v16 = vadd.f32 %v642_v7, %v624_v12  ;;  %v2125_v7 = vor.u32 %v2372_v0, %v2124_v63  ;;  %v2196_v12 = vld [vmem:[%s3495_s9 + $0x1f0] sm:$0xf] }
 0x244   :  { %v2197_v19 = vor.u32 %v2390_v13, %v2196_v12  ;;  %v1972_v63 = vld [vmem:[%s3495_s9 + $0x30] sm:$0xf] }
 0x245   :  { %v658_v21 = vmul.f32 %v2717_v16, %v2717_v16  ;;  %v648_v25 = vadd.f32 %v647_v20, %v2717_v16  ;;  %v2116_v20 = vld [vmem:[%s3495_s9 + $0x150] sm:$0xf]  ;;  %1360 = vmatpush.bf16.msra.mxu3 %v2125_v7  ;;  %v2092_v7 = vld [vmem:[%s3495_s9 + $0x120] sm:$0xf] }
 0x246   :  { %1378 = vmatpush.bf16.msrb.mxu0 %v2197_v19  ;;  %v2093_v13 = vor.u32 %v2364_v8, %v2092_v7  ;;  %v2036_v19 = vld [vmem:[%s3495_s9 + $0xb0] sm:$0xf]  ;;  %v2006_v7 = vld [vmem:[%s3495_s9 + $0x78] sm:$0xf0]  ;;  %v2373_v8 = vld [vmem:[%s3495_s9 + $0x174] sm:$0xf] }
 0x247   :  { %v661_v27 = vadd.f32 %v660_v24, %v658_v21  ;;  %v2370_v21 = vld [vmem:[%s3495_s9 + $0x154] sm:$0xf0]  ;;  %v2060_v24 = vld [vmem:[%s3495_s9 + $0xe0] sm:$0xf] }
 0x24a   :  { %v644_v23 = vpop.f32.mrf.mxu2 }
 0x24b   :  { %v2728_v26 = vadd.f32 %v644_v23, %v626_v22  ;;  %v1988_v22 = vld [vmem:[%s3495_s9 + $0x50] sm:$0xf]  ;;  %v2338_v23 = vld [vmem:[%s3495_s9 + $0x54] sm:$0xf0] }
 0x24d   :  { %v649_v28 = vadd.f32 %v648_v25, %v2728_v26  ;;  %v659_v29 = vmul.f32 %v2728_v26, %v2728_v26 }
 0x24f   :  { %v650_v30 = vrot.slane %v649_v28, 4  ;;  %v662_v31 = vadd.f32 %v661_v27, %v659_v29  ;;  %v2356_v27 = vld [vmem:[%s3495_s9 + $0xe4] sm:$0xf0] }
 0x250   :  { %v2388_v29 = vld [vmem:[%s3495_s9 + $0x1e4] sm:$0xf0] }
 0x251   :  { %v651_v32 = vadd.f32 %v650_v30, %v649_v28  ;;  %v663_v33 = vrot.slane %v662_v31, 4  ;;  %v2188_v28 = vld [vmem:[%s3495_s9 + $0x1e0] sm:$0xf]  ;;  %v2117_v30 = vor.u32 %v2370_v21, %v2116_v20  ;;  %v2350_v20 = vld [vmem:[%s3495_s9 + $0xb4] sm:$0xf0] }
 0x252   :  { %v2164_v21 = vld [vmem:[%s3495_s9 + $0x1b0] sm:$0xf] }
 0x253   :  { %v652_v34 = vrot.slane %v651_v32, 2  ;;  %v664_v35 = vadd.f32 %v663_v33, %v662_v31  ;;  %v2061_v31 = vor.u32 %v2356_v27, %v2060_v24  ;;  %v2108_v33 = vld [vmem:[%s3495_s9 + $0x140] sm:$0xf]  ;;  %1361 = vmatpush.bf16.msra.mxu3 %v2117_v30  ;;  %v2084_v24 = vld [vmem:[%s3495_s9 + $0x110] sm:$0xf] }
 0x254   :  { %v2330_v30 = vld [vmem:[%s3495_s9 + $0x14] sm:$0xf0] }
 0x255   :  { %v653_v36 = vadd.f32 %v652_v34, %v651_v32  ;;  %v665_v37 = vrot.slane %v664_v35, 2  ;;  %v2189_v32 = vor.u32 %v2388_v29, %v2188_v28  ;;  %v2368_v34 = vld [vmem:[%s3495_s9 + $0x144] sm:$0xf0]  ;;  %1341 = vmatpush.bf16.msra.mxu2 %v2061_v31  ;;  %v1956_v29 = vld [vmem:[%s3495_s9 + $0x10] sm:$0xf] }
 0x256   :  { %v2109_v46 = vor.u32 %v2368_v34, %v2108_v33  ;;  %v1957_v31 = vor.u32 %v2330_v30, %v1956_v29  ;;  %v2348_v33 = vld [vmem:[%s3495_s9 + $0xa4] sm:$0xf0]  ;;  %v2156_v34 = vld [vmem:[%s3495_s9 + $0x1a0] sm:$0xf]  ;;  %v2351_v30 = vld [vmem:[%s3495_s9 + $0xc4] sm:$0xf] }
 0x257   :  { %v654_v38 = vrot.slane %v653_v36, 1  ;;  %v666_v39 = vadd.f32 %v665_v37, %v664_v35  ;;  %v1980_v35 = vld [vmem:[%s3495_s9 + $0x40] sm:$0xf]  ;;  %v1989_v37 = vor.u32 %v2338_v23, %v1988_v22  ;;  %1379 = vmatpush.bf16.msrb.mxu0 %v2189_v32  ;;  %v2037_v22 = vor.u32 %v2350_v20, %v2036_v19  ;;  %v2382_v23 = vld [vmem:[%s3495_s9 + $0x1b4] sm:$0xf0] }
 0x258   :  { %1362 = vmatpush.bf16.msra.mxu3 %v2109_v46  ;;  %v2165_v27 = vor.u32 %v2382_v23, %v2164_v21  ;;  %v2028_v32 = vld [vmem:[%s3495_s9 + $0xa0] sm:$0xf]  ;;  %v2148_v46 = vld [vmem:[%s3495_s9 + $0x190] sm:$0xf]  ;;  %v2402_v21 = vld [vmem:[%s3495_s9 + $0x254] sm:$0xf0] }
 0x259   :  { %v667_v40 = vrot.slane %v666_v39, 1  ;;  %v655_v41 = vadd.f32 %v654_v38, %v653_v36  ;;  %v2336_v38 = vld [vmem:[%s3495_s9 + $0x44] sm:$0xf0]  ;;  %1323 = vmatpush.bf16.msra.mxu1 %v1989_v37  ;;  %v2076_v37 = vld [vmem:[%s3495_s9 + $0x100] sm:$0xf] }
 0x25a   :  { %v1981_v48 = vor.u32 %v2336_v38, %v1980_v35  ;;  %v2029_v35 = vor.u32 %v2348_v33, %v2028_v32  ;;  %v2360_v38 = vld [vmem:[%s3495_s9 + $0x104] sm:$0xf0]  ;;  %v2244_v20 = vld [vmem:[%s3495_s9 + $0x250] sm:$0xf]  ;;  %v2236_v32 = vld [vmem:[%s3495_s9 + $0x240] sm:$0xf] }
 0x25b   :  { %v668_v42 = vadd.f32 %v667_v40, %v666_v39  ;;  %v2052_v39 = vld [vmem:[%s3495_s9 + $0xd0] sm:$0xf]  ;;  %v2354_v40 = vld [vmem:[%s3495_s9 + $0xd4] sm:$0xf0]  ;;  %v2245_v23 = vor.u32 %v2402_v21, %v2244_v20 }
 0x25c   :  { %v2053_v44 = vor.u32 %v2354_v40, %v2052_v39  ;;  %1363 = vmatpush.bf16.msra.mxu3 %v2101_v62  ;;  %v2077_v40 = vor.u32 %v2360_v38, %v2076_v37  ;;  %v2376_v62 = vld [vmem:[%s3495_s9 + $0x184] sm:$0xf0]  ;;  %v2212_v21 = vld [vmem:[%s3495_s9 + $0x210] sm:$0xf] }
 0x25d   :  { %v669_v43 = vsel %vm185_vm3, %v655_v41, %v668_v42  ;;  %v2180_v41 = vld [vmem:[%s3495_s9 + $0x1d0] sm:$0xf]  ;;  %v2386_v42 = vld [vmem:[%s3495_s9 + $0x1d4] sm:$0xf0]  ;;  %1324 = vmatpush.bf16.msra.mxu1 %v1981_v48 }
 0x25e   :  { %702 = vmatmul.f32.vlgmr.msrb.gmra.mxu3 %v669_v43  ;;  %v2181_v45 = vor.u32 %v2386_v42, %v2180_v41  ;;  %1342 = vmatpush.bf16.msra.mxu2 %v2053_v44  ;;  %v1948_v41 = vld [vmem:[%s3495_s9] sm:$0xf]  ;;  %v2328_v42 = vld [vmem:[%s3495_s9 + $0x4] sm:$0xf0]  ;;  %v2020_v44 = vld [vmem:[%s3495_s9 + $0x90] sm:$0xf] }
 0x25f   :  { %v2378_v48 = vld [vmem:[%s3495_s9 + $0x194] sm:$0xf0] }
 0x260   :  { %1380 = vmatpush.bf16.msrb.mxu0 %v2181_v45  ;;  %1364 = vmatpush.bf16.msra.mxu3 %v2093_v13  ;;  %v2346_v45 = vld [vmem:[%s3495_s9 + $0x94] sm:$0xf0]  ;;  %v2134_v13 = vld [vmem:[%s3495_s9 + $0x178] sm:$0xf0] }
 0x262   :  { %1343 = vmatpush.bf16.msra.mxu2 %v2045_v5 }
 0x266   :  { %1344 = vmatpush.bf16.msra.mxu2 %v2037_v22  ;;  %v2339_v22 = vld [vmem:[%s3495_s9 + $0x64] sm:$0xf] }
 0x26a   :  { %1345 = vmatpush.bf16.msra.mxu2 %v2029_v35  ;;  %v2337_v35 = vld [vmem:[%s3495_s9 + $0x54] sm:$0xf] }
 0x2e1   :  { %v703_v51 = vpop.f32.mrf.mxu3 }
 0x2e2   :  { %v2737_v52 = vmul.f32 %v2734_v50, %v703_v51  ;;  %v730_v51 = vld [vmem:[%s3496_s5] sm:$0x1] }
 0x2e4   :  { %v714_v53 = vmul.f32 %v2737_v52, %v2737_v52 }
 0x2e6   :  { %v716_v54 = vrot.slane %v714_v53, 7 }
 0x2e8   :  { %v718_v55 = vsub.f32 %v2737_v52, %v716_v54 }
 0x2ea   :  { %v2742_v56 = vadd.f32 1e-05, %v718_v55  ;;  %v737_v55 = vld [vmem:[%s3497_s6] sm:$0x1] }
 0x2ec   :  { %2411 = vrsqrt.f32 %v2742_v56  ;;  %vm726_vm13 = vweird.f32 %v2742_v56 }
 0x2f2   :  { %v2412_v6 = vpop.eup %2411 }
 0x2f3   :  { %v721_v14 = vmul.f32 %v2412_v6, %v2742_v56  ;;  %vm727_vm12 = vweird.f32 %v2412_v6 }
 0x2f4   :  { %vm728_vm14 = vmor %vm726_vm13, %vm727_vm12 }
 0x2f5   :  { %v722_v25 = vmul.f32 %v2412_v6, %v721_v14  ;;  %v1964_v14 = vld [vmem:[%s3495_s9 + $0x20] sm:$0xf] }
 0x2f6   :  { %v1965_v18 = vor.u32 %v2332_v17, %v1964_v14  ;;  %v2353_v14 = vld [vmem:[%s3495_s9 + $0xd4] sm:$0xf]  ;;  %v2054_v17 = vld [vmem:[%s3495_s9 + $0xd8] sm:$0xf0] }
 0x2f7   :  { %v723_v36 = vmul.f32 0.5, %v722_v25  ;;  %v2362_v25 = vld [vmem:[%s3495_s9 + $0x114] sm:$0xf0]  ;;  %v2057_v19 = vor.u32 %v2353_v14, %v2054_v17  ;;  %v2022_v14 = vld [vmem:[%s3495_s9 + $0x98] sm:$0xf0] }
 0x2f8   :  { %v2085_v28 = vor.u32 %v2362_v25, %v2084_v24  ;;  %v1998_v24 = vld [vmem:[%s3495_s9 + $0x68] sm:$0xf0]  ;;  %v2371_v25 = vld [vmem:[%s3495_s9 + $0x164] sm:$0xf] }
 0x2f9   :  { %v724_v43 = vsub.f32 1.5, %v723_v36  ;;  %v2380_v36 = vld [vmem:[%s3495_s9 + $0x1a4] sm:$0xf0] }
 0x2fa   :  { %1365 = vmatpush.bf16.msra.mxu3 %v2085_v28  ;;  %v2157_v39 = vor.u32 %v2380_v36, %v2156_v34  ;;  %v2001_v28 = vor.u32 %v2339_v22, %v1998_v24  ;;  %v2400_v34 = vld [vmem:[%s3495_s9 + $0x244] sm:$0xf0]  ;;  %v1990_v36 = vld [vmem:[%s3495_s9 + $0x58] sm:$0xf0]  ;;  %v2394_v24 = vld [vmem:[%s3495_s9 + $0x214] sm:$0xf0] }
 0x2fb   :  { %v725_v47 = vmul.f32 %v2412_v6, %v724_v43  ;;  %v1949_v43 = vor.u32 %v2328_v42, %v1948_v41  ;;  %v2237_v37 = vor.u32 %v2400_v34, %v2236_v32  ;;  %v1993_v38 = vor.u32 %v2337_v35, %v1990_v36  ;;  %v2349_v42 = vld [vmem:[%s3495_s9 + $0xb4] sm:$0xf]  ;;  %v2343_v32 = vld [vmem:[%s3495_s9 + $0x84] sm:$0xf]  ;;  %v2014_v36 = vld [vmem:[%s3495_s9 + $0x88] sm:$0xf0] }
 0x2fd   :  { %v729_v49 = vsel %vm728_vm14, %v2412_v6, %v725_v47  ;;  %v2384_v6 = vld [vmem:[%s3495_s9 + $0x1c4] sm:$0xf0]  ;;  %v2021_v47 = vor.u32 %v2346_v45, %v2020_v44  ;;  %v2228_v45 = vld [vmem:[%s3495_s9 + $0x230] sm:$0xf] }
 0x2fe   :  { %732 = vst [vmem:[#allocation1] sm:$0xff] %v729_v49  ;;  %v2173_v12 = vor.u32 %v2384_v6, %v2172_v3  ;;  %1366 = vmatpush.bf16.msra.mxu3 %v2077_v40  ;;  %v2357_v49 = vld [vmem:[%s3495_s9 + $0xf4] sm:$0xf]  ;;  %v2404_v3 = vld [vmem:[%s3495_s9 + $0x264] sm:$0xf0] }
 0x2ff   :  { %1346 = vmatpush.bf16.msra.mxu2 %v2021_v47  ;;  %v2253_v5 = vor.u32 %v2404_v3, %v2252_v2  ;;  %v2341_v6 = vld [vmem:[%s3495_s9 + $0x74] sm:$0xf]  ;;  %v2118_v40 = vld [vmem:[%s3495_s9 + $0x158] sm:$0xf0]  ;;  %v2396_v2 = vld [vmem:[%s3495_s9 + $0x224] sm:$0xf0] }
 0x300   :  { %1381 = vmatpush.bf16.msrb.mxu0 %v2173_v12  ;;  %v2009_v12 = vor.u32 %v2341_v6, %v2006_v7 }
 0x304   :  { %1382 = vmatpush.bf16.msrb.mxu0 %v2165_v27  ;;  %v2126_v27 = vld [vmem:[%s3495_s9 + $0x168] sm:$0xf0] }
 0x305   :  { %v734_v53 = vld [vmem:[#allocation1 + $0x1] ss:$9 sm:$0xff]  ;;  %v2129_v29 = vor.u32 %v2371_v25, %v2126_v27 }
 0x306   :  { %v736_v54 = vmul.f32 %v734_v53, %v730_v51  ;;  %v2070_v51 = vld [vmem:[%s3495_s9 + $0xf8] sm:$0xf0]  ;;  %v2149_v53 = vor.u32 %v2378_v48, %v2148_v46  ;;  %v2398_v46 = vld [vmem:[%s3495_s9 + $0x234] sm:$0xf0]  ;;  %v2331_v25 = vld [vmem:[%s3495_s9 + $0x24] sm:$0xf] }
 0x307   :  { %v2229_v48 = vor.u32 %v2398_v46, %v2228_v45  ;;  %v1966_v27 = vld [vmem:[%s3495_s9 + $0x28] sm:$0xf0] }
 0x308   :  { %v738_v56 = vmul.f32 %v736_v54, %v2737_v52  ;;  %v2334_v52 = vld [vmem:[%s3495_s9 + $0x34] sm:$0xf0]  ;;  %1383 = vmatpush.bf16.msrb.mxu0 %v2157_v39  ;;  %v2369_v39 = vld [vmem:[%s3495_s9 + $0x154] sm:$0xf]  ;;  %v1969_v34 = vor.u32 %v2331_v25, %v1966_v27 }
 0x309   :  { %v1973_v0 = vor.u32 %v2334_v52, %v1972_v63  ;;  %v2355_v63 = vld [vmem:[%s3495_s9 + $0xe4] sm:$0xf]  ;;  %v2062_v52 = vld [vmem:[%s3495_s9 + $0xe8] sm:$0xf0]  ;;  %v2121_v41 = vor.u32 %v2369_v39, %v2118_v40  ;;  %v2401_v27 = vld [vmem:[%s3495_s9 + $0x254] sm:$0xf] }
 0x30a   :  { %v739_v57 = vsub.f32 %v737_v55, %v738_v56  ;;  %v2260_v55 = vld [vmem:[%s3495_s9 + $0x270] sm:$0xf]  ;;  %v2406_v56 = vld [vmem:[%s3495_s9 + $0x274] sm:$0xf0]  ;;  %v2065_v1 = vor.u32 %v2355_v63, %v2062_v52 }
 0x30b   :  { %1325 = vmatpush.bf16.msra.mxu1 %v1973_v0  ;;  %v2141_v0 = vor.u32 %v2376_v62, %v2140_v60  ;;  %v2030_v60 = vld [vmem:[%s3495_s9 + $0xa8] sm:$0xf0] }
 0x30c   :  { %v741_v58 = vperm.slane %v739_v57, 0  ;;  %1384 = vmatpush.bf16.msrb.mxu0 %v2149_v53  ;;  %v2012_v57 = vld [vmem:[%s3495_s9 + $0x80] sm:$0xf]  ;;  %v2367_v53 = vld [vmem:[%s3495_s9 + $0x144] sm:$0xf] }
 0x30e   :  { %v743_v59 = vsel %vm185_vm3, %v736_v54, %v741_v58  ;;  %v2073_v54 = vor.u32 %v2357_v49, %v2070_v51  ;;  %v2344_v58 = vld [vmem:[%s3495_s9 + $0x84] sm:$0xf0]  ;;  %v2335_v49 = vld [vmem:[%s3495_s9 + $0x44] sm:$0xf]  ;;  %v1982_v51 = vld [vmem:[%s3495_s9 + $0x48] sm:$0xf0] }
 0x30f   :  { %1945 = vmatmul.msk.f32.vlgmr.msra.gmra.mxu0 %vm745_vm15, %v743_v59  ;;  %1326 = vmatpush.bf16.msra.mxu1 %v1965_v18  ;;  %v2261_v59 = vor.u32 %v2406_v56, %v2260_v55  ;;  %v2013_v61 = vor.u32 %v2344_v58, %v2012_v57  ;;  %v2137_v18 = vor.u32 %v2373_v8, %v2134_v13  ;;  %v2110_v56 = vld [vmem:[%s3495_s9 + $0x148] sm:$0xf0]  ;;  %v2347_v57 = vld [vmem:[%s3495_s9 + $0xa4] sm:$0xf]  ;;  %v2345_v13 = vld [vmem:[%s3495_s9 + $0x94] sm:$0xf] }
 0x310   :  { %1435 = vmatpush.bf16.msrb.mxu3 %v2073_v54  ;;  %1385 = vmatpush.bf16.msrb.mxu0 %v2141_v0  ;;  %v1985_v55 = vor.u32 %v2335_v49, %v1982_v51  ;;  %v2033_v0 = vor.u32 %v2347_v57, %v2030_v60  ;;  %v2361_v49 = vld [vmem:[%s3495_s9 + $0x114] sm:$0xf]  ;;  %v2086_v51 = vld [vmem:[%s3495_s9 + $0x118] sm:$0xf0] }
 0x311   :  { %1347 = vmatpush.bf16.msra.mxu2 %v2013_v61  ;;  %v2389_v57 = vld [vmem:[%s3495_s9 + $0x1f4] sm:$0xf] }
 0x313   :  { %1327 = vmatpush.bf16.msra.mxu1 %v1957_v31  ;;  %v2046_v31 = vld [vmem:[%s3495_s9 + $0xc8] sm:$0xf0] }
 0x314   :  { %1436 = vmatpush.bf16.msrb.mxu3 %v2065_v1  ;;  %1454 = vmatpush.bf16.msra.mxu0 %v2137_v18  ;;  %v2049_v33 = vor.u32 %v2351_v30, %v2046_v31  ;;  %v2220_v1 = vld [vmem:[%s3495_s9 + $0x220] sm:$0xf]  ;;  %v2363_v30 = vld [vmem:[%s3495_s9 + $0x124] sm:$0xf]  ;;  %v2094_v31 = vld [vmem:[%s3495_s9 + $0x128] sm:$0xf0] }
 0x315   :  { %1416 = vmatpush.bf16.msrb.mxu2 %v2009_v12  ;;  %v2221_v7 = vor.u32 %v2396_v2, %v2220_v1  ;;  %v2102_v12 = vld [vmem:[%s3495_s9 + $0x138] sm:$0xf0]  ;;  %v2097_v35 = vor.u32 %v2363_v30, %v2094_v31  ;;  %v2359_v1 = vld [vmem:[%s3495_s9 + $0x104] sm:$0xf]  ;;  %v2174_v30 = vld [vmem:[%s3495_s9 + $0x1c8] sm:$0xf0] }
 0x317   :  { %1328 = vmatpush.bf16.msra.mxu1 %v1949_v43  ;;  %v2038_v43 = vld [vmem:[%s3495_s9 + $0xb8] sm:$0xf0] }
 0x318   :  { %1437 = vmatpush.bf16.msrb.mxu3 %v2057_v19  ;;  %1455 = vmatpush.bf16.msra.mxu0 %v2129_v29  ;;  %v2041_v44 = vor.u32 %v2349_v42, %v2038_v43  ;;  %v1958_v42 = vld [vmem:[%s3495_s9 + $0x18] sm:$0xf0]  ;;  %v2017_v43 = vor.u32 %v2343_v32, %v2014_v36  ;;  %v2381_v36 = vld [vmem:[%s3495_s9 + $0x1b4] sm:$0xf] }
 0x319   :  { %1417 = vmatpush.bf16.msrb.mxu2 %v2001_v28 }
 0x31b   :  { %1397 = vmatpush.bf16.msrb.mxu1 %v2261_v59  ;;  %v2113_v59 = vor.u32 %v2367_v53, %v2110_v56  ;;  %v2089_v53 = vor.u32 %v2361_v49, %v2086_v51  ;;  %v2397_v49 = vld [vmem:[%s3495_s9 + $0x234] sm:$0xf]  ;;  %v2230_v51 = vld [vmem:[%s3495_s9 + $0x238] sm:$0xf0] }
 0x31c   :  { %1438 = vmatpush.bf16.msrb.mxu3 %v2049_v33  ;;  %1456 = vmatpush.bf16.msra.mxu0 %v2121_v41  ;;  %v2213_v33 = vor.u32 %v2394_v24, %v2212_v21  ;;  %v2329_v41 = vld [vmem:[%s3495_s9 + $0x14] sm:$0xf]  ;;  %v2254_v21 = vld [vmem:[%s3495_s9 + $0x268] sm:$0xf0] }
 0x31d   :  { %1418 = vmatpush.bf16.msrb.mxu2 %v1993_v38  ;;  %v2392_v38 = vld [vmem:[%s3495_s9 + $0x204] sm:$0xf0]  ;;  %v1961_v45 = vor.u32 %v2329_v41, %v1958_v42  ;;  %v2238_v41 = vld [vmem:[%s3495_s9 + $0x248] sm:$0xf0] }
 0x31f   :  { %1398 = vmatpush.bf16.msrb.mxu1 %v2253_v5 }
 0x320   :  { %1439 = vmatpush.bf16.msrb.mxu3 %v2041_v44  ;;  %1457 = vmatpush.bf16.msra.mxu0 %v2113_v59 }
 0x321   :  { %1419 = vmatpush.bf16.msrb.mxu2 %v1985_v55 }
 0x323   :  { %1399 = vmatpush.bf16.msrb.mxu1 %v2245_v23  ;;  %v2025_v23 = vor.u32 %v2345_v13, %v2022_v14  ;;  %v2405_v13 = vld [vmem:[%s3495_s9 + $0x274] sm:$0xf]  ;;  %v2262_v14 = vld [vmem:[%s3495_s9 + $0x278] sm:$0xf0] }
 0x324   :  { %1440 = vmatpush.bf16.msrb.mxu3 %v2033_v0  ;;  %v2198_v0 = vld [vmem:[%s3495_s9 + $0x1f8] sm:$0xf0] }
 0x327   :  { %1400 = vmatpush.bf16.msrb.mxu1 %v2237_v37  ;;  %v2204_v37 = vld [vmem:[%s3495_s9 + $0x200] sm:$0xf] }
 0x328   :  { %1441 = vmatpush.bf16.msrb.mxu3 %v2025_v23  ;;  %v2205_v44 = vor.u32 %v2392_v38, %v2204_v37  ;;  %v2166_v37 = vld [vmem:[%s3495_s9 + $0x1b8] sm:$0xf0] }
 0x32b   :  { %1401 = vmatpush.bf16.msrb.mxu1 %v2229_v48 }
 0x32c   :  { %1442 = vmatpush.bf16.msrb.mxu3 %v2017_v43  ;;  %v2169_v43 = vor.u32 %v2381_v36, %v2166_v37 }
 0x32f   :  { %1402 = vmatpush.bf16.msrb.mxu1 %v2221_v7 }
 0x333   :  { %1403 = vmatpush.bf16.msrb.mxu1 %v2213_v33 }
 0x337   :  { %1404 = vmatpush.bf16.msrb.mxu1 %v2205_v44  ;;  %v2379_v44 = vld [vmem:[%s3495_s9 + $0x1a4] sm:$0xf] }
 0x38c   :  { %v766_v47 = vpop.f32.mrf.mxu0 }
 0x38d   :  { %v769_v54 = vperm.slane %v766_v47, 0  ;;  %v774_v58 = vperm.slane %v766_v47, 1 }
 0x38f   :  { %v770_v61 = vmul.f32 %v769_v54, %v2715_v15  ;;  %v771_v62 = vmul.f32 %v769_v54, %v2713_v10  ;;  %v772_v63 = vmul.f32 %v769_v54, %v2717_v16  ;;  %v773_v52 = vmul.f32 %v769_v54, %v2728_v26  ;;  %v2333_v10 = vld [vmem:[%s3495_s9 + $0x34] sm:$0xf]  ;;  %v1974_v16 = vld [vmem:[%s3495_s9 + $0x38] sm:$0xf0] }
 0x390   :  { %v2365_v26 = vld [vmem:[%s3495_s9 + $0x134] sm:$0xf]  ;;  %v1977_v8 = vor.u32 %v2333_v10, %v1974_v16  ;;  %v2387_v10 = vld [vmem:[%s3495_s9 + $0x1e4] sm:$0xf]  ;;  %v2190_v16 = vld [vmem:[%s3495_s9 + $0x1e8] sm:$0xf0] }
 0x391   :  { %v775_v3 = vadd.f32 %v774_v58, %v770_v61  ;;  %v776_v5 = vadd.f32 %v774_v58, %v771_v62  ;;  %v777_v15 = vadd.f32 %v774_v58, %v772_v63  ;;  %v778_v6 = vadd.f32 %v774_v58, %v773_v52  ;;  %v2327_v62 = vld [vmem:[%s3495_s9 + $0x4] sm:$0xf]  ;;  %v1950_v63 = vld [vmem:[%s3495_s9 + $0x8] sm:$0xf0] }
 0x392   :  { %1420 = vmatpush.bf16.msrb.mxu2 %v1977_v8  ;;  %v2105_v22 = vor.u32 %v2365_v26, %v2102_v12  ;;  %v1953_v52 = vor.u32 %v2327_v62, %v1950_v63  ;;  %v2193_v12 = vor.u32 %v2387_v10, %v2190_v16  ;;  %v2375_v62 = vld [vmem:[%s3495_s9 + $0x184] sm:$0xf]  ;;  %v2142_v63 = vld [vmem:[%s3495_s9 + $0x188] sm:$0xf0]  ;;  %v1572_v10 = vld [vmem:[%s3498_s12 + $0x78] sm:$0xff] }
 0x393   :  { %v779_v17 = vmax.f32 %v775_v3, 0.0  ;;  %v780_v18 = vmax.f32 %v776_v5, 0.0  ;;  %v781_v19 = vmax.f32 %v777_v15, 0.0  ;;  %v782_v20 = vmax.f32 %v778_v6, 0.0  ;;  %v2078_v15 = vld [vmem:[%s3495_s9 + $0x108] sm:$0xf0] }
 0x394   :  { %1458 = vmatpush.bf16.msra.mxu0 %v2105_v22  ;;  %v2201_v5 = vor.u32 %v2389_v57, %v2198_v0  ;;  %v2081_v6 = vor.u32 %v2359_v1, %v2078_v15  ;;  %v2150_v57 = vld [vmem:[%s3495_s9 + $0x198] sm:$0xf0]  ;;  %v2145_v1 = vor.u32 %v2375_v62, %v2142_v63 }
 0x395   :  { %v783_v28 = vpack.c.bf16 %v779_v17, %v779_v17  ;;  %v784_v29 = vpack.c.bf16 %v780_v18, %v780_v18  ;;  %v785_v46 = vpack.c.bf16 %v781_v19, %v781_v19  ;;  %v786_v47 = vpack.c.bf16 %v782_v20, %v782_v20  ;;  %v2385_v18 = vld [vmem:[%s3495_s9 + $0x1d4] sm:$0xf]  ;;  %v2182_v19 = vld [vmem:[%s3495_s9 + $0x1d8] sm:$0xf0]  ;;  %v2403_v20 = vld [vmem:[%s3495_s9 + $0x264] sm:$0xf] }
 0x396   :  { %1421 = vmatpush.bf16.msrb.mxu2 %v1969_v34  ;;  %v2265_v17 = vor.u32 %v2405_v13, %v2262_v14  ;;  %v2257_v22 = vor.u32 %v2403_v20, %v2254_v21  ;;  %v2185_v25 = vor.u32 %v2385_v18, %v2182_v19  ;;  %v1568_v13 = vld [vmem:[%s3498_s12 + $0x58] sm:$0xff]  ;;  %v1567_v14 = vld [vmem:[%s3498_s12 + $0x50] sm:$0xff]  ;;  %v1566_v19 = vld [vmem:[%s3498_s12 + $0x48] sm:$0xff] }
 0x397   :  { %v791_v39 = vunpack.c.l.b16 %v783_v28  ;;  %v792_v40 = vunpack.c.l.b16 %v784_v29  ;;  %v793_v58 = vunpack.c.l.b16 %v785_v46  ;;  %v794_v59 = vunpack.c.l.b16 %v786_v47  ;;  %v2246_v28 = vld [vmem:[%s3495_s9 + $0x258] sm:$0xf0]  ;;  %v2383_v29 = vld [vmem:[%s3495_s9 + $0x1c4] sm:$0xf] }
 0x398   :  { %1459 = vmatpush.bf16.msra.mxu0 %v2097_v35  ;;  %v2249_v31 = vor.u32 %v2401_v27, %v2246_v28  ;;  %v2177_v34 = vor.u32 %v2383_v29, %v2174_v30  ;;  %v1565_v21 = vld [vmem:[%s3498_s12 + $0x40] sm:$0xff]  ;;  %v1562_v27 = vld [vmem:[%s3498_s12 + $0x28] sm:$0xff] }
 0x399   :  { %v3128_v48 = vpack.c.b16 %v792_v40, %v791_v39  ;;  %v3168_v26 = vpack.c.b16 %v794_v59, %v793_v58  ;;  %v2399_v40 = vld [vmem:[%s3495_s9 + $0x244] sm:$0xf]  ;;  %v2393_v59 = vld [vmem:[%s3495_s9 + $0x214] sm:$0xf] }
 0x39a   :  { %1422 = vmatpush.bf16.msrb.mxu2 %v1961_v45  ;;  %v2241_v42 = vor.u32 %v2399_v40, %v2238_v41  ;;  %v2158_v45 = vld [vmem:[%s3495_s9 + $0x1a8] sm:$0xf0]  ;;  %v1561_v30 = vld [vmem:[%s3498_s12 + $0x20] sm:$0xff] }
 0x39b   :  { %1367 = vmatmul.bf16.vlgmr.msra.gmra.mxu3 %v3128_v48  ;;  %v797_v54 = vrot.slane %v3128_v48, 7  ;;  %v806_v55 = vshrl.u32 %v3128_v48, 16  ;;  %v809_v56 = vshll.u32 %v3128_v48, 16  ;;  %v813_v23 = vshrl.u32 %v3168_v26, 16  ;;  %v1557_v41 = vld [vmem:[%s3498_s12] sm:$0xff] }
 0x39c   :  { %1460 = vmatpush.bf16.msra.mxu0 %v2089_v53  ;;  %v816_v24 = vshll.u32 %v3168_v26, 16  ;;  %v798_v35 = vrot.slane %v3168_v26, 7  ;;  %v2233_v53 = vor.u32 %v2397_v49, %v2230_v51  ;;  %v2161_v9 = vor.u32 %v2379_v44, %v2158_v45  ;;  %1589 = vmatpush.msra.mxu3 %v1572_v10  ;;  %v1586_v10 = vld [vmem:[%s3498_s12 + $0xe8] sm:$0xff] }
 0x39d   :  { %2267 = vmatmul.msk.bf16.vlgmr.msra.gmra.mxu1 %vm2634_vm4, %v797_v54  ;;  %v808_v60 = vrot.slane %v806_v55, 7  ;;  %v823_v61 = vrot.slane %v809_v56, 1  ;;  %v815_v32 = vrot.slane %v813_v23, 7  ;;  %v831_v0 = vrot.slane %v3128_v48, 1 }
 0x39e   :  { %1423 = vmatpush.bf16.msrb.mxu2 %v1953_v52  ;;  %1473 = vmatpush.bf16.msra.mxu1 %v2201_v5  ;;  %v825_v33 = vrot.slane %v816_v24, 1  ;;  %v832_v15 = vrot.slane %v3168_v26, 1 }
 0x39f   :  { %v811_v2 = vor.u32 %v809_v56, %v808_v60  ;;  %v824_v3 = vor.u32 %v823_v61, %v806_v55  ;;  %v818_v38 = vor.u32 %v816_v24, %v815_v32  ;;  %v2395_v55 = vld [vmem:[%s3495_s9 + $0x224] sm:$0xf]  ;;  %v2377_v56 = vld [vmem:[%s3495_s9 + $0x194] sm:$0xf]  ;;  %v2214_v60 = vld [vmem:[%s3495_s9 + $0x218] sm:$0xf0]  ;;  %1590 = vmatpush.msra.mxu3 %v1571_v4 }
 0x3a0   :  { %1461 = vmatpush.bf16.msra.mxu0 %v2081_v6  ;;  %v826_v39 = vor.u32 %v825_v33, %v813_v23  ;;  %v2225_v58 = vor.u32 %v2395_v55, %v2222_v11  ;;  %v2153_v61 = vor.u32 %v2377_v56, %v2150_v57  ;;  %v2217_v52 = vor.u32 %v2393_v59, %v2214_v60  ;;  %v1563_v24 = vld [vmem:[%s3498_s12 + $0x30] sm:$0xff] }
 0x3a1   :  { %v3172_v7 = vsel %vm2641_vm8, 0, %v811_v2  ;;  %v3176_v8 = vsel %vm2645_vm9, %v824_v3, 0  ;;  %v822_v46 = vsel %vm2641_vm8, 0, %v818_v38  ;;  %v2391_v2 = vld [vmem:[%s3495_s9 + $0x204] sm:$0xf]  ;;  %v1559_v32 = vld [vmem:[%s3498_s12 + $0x10] sm:$0xff] }
 0x3a2   :  { %1348 = vmatmul.bf16.vlgmr.msra.gmra.mxu2 %v3172_v7  ;;  %1386 = vmatmul.bf16.vlgmr.msrb.gmra.mxu0 %v3176_v8  ;;  %v830_v47 = vsel %vm2645_vm9, %v826_v39, 0  ;;  %v2206_v3 = vld [vmem:[%s3495_s9 + $0x208] sm:$0xf0] }
 0x3a3   :  { %1492 = vmatpush.bf16.msra.mxu2 %v2265_v17  ;;  %1474 = vmatpush.bf16.msra.mxu1 %v2193_v12  ;;  %v2209_v5 = vor.u32 %v2391_v2, %v2206_v3  ;;  %v1558_v38 = vld [vmem:[%s3498_s12 + $0x8] sm:$0xff] }
 0x3a7   :  { %1493 = vmatpush.bf16.msra.mxu2 %v2257_v22  ;;  %1475 = vmatpush.bf16.msra.mxu1 %v2185_v25  ;;  %v1564_v22 = vld [vmem:[%s3498_s12 + $0x38] sm:$0xff] }
 0x3ab   :  { %1372 = vmatmul.bf16.gmra.mxu3 %v3168_v26  ;;  %1494 = vmatpush.bf16.msra.mxu2 %v2249_v31  ;;  %v1560_v31 = vld [vmem:[%s3498_s12 + $0x18] sm:$0xff] }
 0x3ac   :  { %1476 = vmatpush.bf16.msra.mxu1 %v2177_v34 }
 0x3ad   :  { %2269 = vmatmul.msk.bf16.gmra.mxu1 %vm2634_vm4, %v798_v35 }
 0x3af   :  { %1495 = vmatpush.bf16.msra.mxu2 %v2241_v42 }
 0x3b0   :  { %1477 = vmatpush.bf16.msra.mxu1 %v2169_v43 }
 0x3b2   :  { %1353 = vmatmul.bf16.gmra.mxu2 %v822_v46  ;;  %1391 = vmatmul.bf16.gmra.mxu0 %v830_v47 }
 0x3b3   :  { %1496 = vmatpush.bf16.msra.mxu2 %v2233_v53 }
 0x3b4   :  { %1478 = vmatpush.bf16.msra.mxu1 %v2161_v9 }
 0x3b7   :  { %1497 = vmatpush.bf16.msra.mxu2 %v2225_v58 }
 0x3b8   :  { %1479 = vmatpush.bf16.msra.mxu1 %v2153_v61 }
 0x3bb   :  { %1443 = vmatmul.bf16.vlgmr.msrb.gmra.mxu3 %v3172_v7  ;;  %1498 = vmatpush.bf16.msra.mxu2 %v2217_v52 }
 0x3bc   :  { %1480 = vmatpush.bf16.msra.mxu1 %v2145_v1 }
 0x3bd   :  { %2270 = vmatmul.msk.bf16.vlgmr.msrb.gmra.mxu1 %vm225_vm10, %v831_v0 }
 0x3bf   :  { %1499 = vmatpush.bf16.msra.mxu2 %v2209_v5  ;;  %v1587_v5 = vld [vmem:[%s3498_s12 + $0xf0] sm:$0xff] }
 0x3c2   :  { %2273 = vmatmul.msk.bf16.vlgmr.msrb.gmra.mxu2 %vm2634_vm4, %v797_v54  ;;  %1462 = vmatmul.bf16.vlgmr.msra.gmra.mxu0 %v3128_v48 }
 0x3cb   :  { %1448 = vmatmul.bf16.gmra.mxu3 %v822_v46 }
 0x3cd   :  { %2271 = vmatmul.msk.bf16.gmra.mxu1 %vm225_vm10, %v832_v15 }
 0x3d2   :  { %2275 = vmatmul.msk.bf16.gmra.mxu2 %vm2634_vm4, %v798_v35  ;;  %1467 = vmatmul.bf16.gmra.mxu0 %v3168_v26  ;;  %v1570_v26 = vld [vmem:[%s3498_s12 + $0x68] sm:$0xff] }
 0x3d3   :  { %1591 = vmatpush.msra.mxu3 %v1570_v26 }
 0x3dd   :  { %1481 = vmatmul.bf16.vlgmr.msra.gmra.mxu1 %v3176_v8  ;;  %v1569_v8 = vld [vmem:[%s3498_s12 + $0x60] sm:$0xff] }
 0x3de   :  { %1592 = vmatpush.msra.mxu3 %v1569_v8 }
 0x3e0   :  { %1593 = vmatpush.msra.mxu3 %v1568_v13 }
 0x3e2   :  { %2276 = vmatmul.msk.bf16.vlgmr.msra.gmra.mxu2 %vm225_vm10, %v831_v0  ;;  %1594 = vmatpush.msra.mxu3 %v1567_v14  ;;  %v1588_v0 = vld [vmem:[%s3498_s12 + $0xf8] sm:$0xff] }
 0x3e3   :  { %1609 = vmatpush.msrb.mxu0 %v1588_v0  ;;  %v1584_v14 = vld [vmem:[%s3498_s12 + $0xd8] sm:$0xff] }
 0x3e4   :  { %1595 = vmatpush.msra.mxu3 %v1566_v19 }
 0x3e5   :  { %1610 = vmatpush.msrb.mxu0 %v1587_v5 }
 0x3e6   :  { %1596 = vmatpush.msra.mxu3 %v1565_v21 }
 0x3e7   :  { %1611 = vmatpush.msrb.mxu0 %v1586_v10 }
 0x3e8   :  { %1597 = vmatpush.msra.mxu3 %v1564_v22 }
 0x3ea   :  { %1598 = vmatpush.msra.mxu3 %v1563_v24  ;;  %v1582_v24 = vld [vmem:[%s3498_s12 + $0xc8] sm:$0xff] }
 0x3ec   :  { %1599 = vmatpush.msra.mxu3 %v1562_v27 }
 0x3ed   :  { %1486 = vmatmul.bf16.gmra.mxu1 %v830_v47 }
 0x3ee   :  { %1600 = vmatpush.msra.mxu3 %v1561_v30 }
 0x3f0   :  { %1601 = vmatpush.msra.mxu3 %v1560_v31  ;;  %v1580_v31 = vld [vmem:[%s3498_s12 + $0xb8] sm:$0xff] }
 0x3f2   :  { %2277 = vmatmul.msk.bf16.gmra.mxu2 %vm225_vm10, %v832_v15  ;;  %1602 = vmatpush.msra.mxu3 %v1559_v32 }
 0x3f4   :  { %1603 = vmatpush.msra.mxu3 %v1558_v38 }
 0x3f6   :  { %1604 = vmatpush.msra.mxu3 %v1557_v41  ;;  %v1577_v41 = vld [vmem:[%s3498_s12 + $0xa0] sm:$0xff] }
 0x41a   :  { %v1330_v54 = vpop.f32.mrf.mxu1 }
 0x41e   :  { %v1368_v12 = vpop.f32.mrf.mxu3 }
 0x41f   :  { %v1387_v17 = vpop.f32.mrf.mxu0 }
 0x422   :  { %v1332_v6 = vpop.f32.mrf.mxu1 }
 0x425   :  { %v1349_v48 = vpop.f32.mrf.mxu2 }
 0x426   :  { %v1370_v23 = vpop.f32.mrf.mxu3  ;;  %v1350_v36 = vadd.f32 %v1349_v48, %v1330_v54 }
 0x427   :  { %v1389_v28 = vpop.f32.mrf.mxu0 }
 0x428   :  { %v1369_v43 = vadd.f32 %v1368_v12, %v1350_v36 }
 0x42a   :  { %v1335_v16 = vpop.f32.mrf.mxu1  ;;  %v1388_v49 = vadd.f32 %v1387_v17, %v1369_v43  ;;  %v1583_v17 = vld [vmem:[%s3498_s12 + $0xd0] sm:$0xff] }
 0x42b   :  { %v1575_v43 = vld [vmem:[%s3498_s12 + $0x90] sm:$0xff] }
 0x42d   :  { %v1351_v7 = vpop.f32.mrf.mxu2 }
 0x42e   :  { %v1352_v33 = vadd.f32 %v1351_v7, %v1332_v6  ;;  %v1373_v34 = vpop.f32.mrf.mxu3  ;;  %v1585_v7 = vld [vmem:[%s3498_s12 + $0xe0] sm:$0xff] }
 0x42f   :  { %v1392_v42 = vpop.f32.mrf.mxu0  ;;  %1612 = vmatpush.msrb.mxu0 %v1585_v7 }
 0x430   :  { %v1371_v39 = vadd.f32 %v1370_v23, %v1352_v33 }
 0x431   :  { %1613 = vmatpush.msrb.mxu0 %v1584_v14 }
 0x432   :  { %v1337_v18 = vpop.f32.mrf.mxu1  ;;  %v1390_v46 = vadd.f32 %v1389_v28, %v1371_v39  ;;  %v1581_v28 = vld [vmem:[%s3498_s12 + $0xc0] sm:$0xff]  ;;  %v1578_v39 = vld [vmem:[%s3498_s12 + $0xa8] sm:$0xff] }
 0x433   :  { %1614 = vmatpush.msrb.mxu0 %v1583_v17 }
 0x435   :  { %v1354_v20 = vpop.f32.mrf.mxu2  ;;  %1615 = vmatpush.msrb.mxu0 %v1582_v24 }
 0x436   :  { %v1355_v37 = vadd.f32 %v1354_v20, %v1335_v16  ;;  %v1375_v55 = vpop.f32.mrf.mxu3 }
 0x437   :  { %v1394_v59 = vpop.f32.mrf.mxu0  ;;  %1616 = vmatpush.msrb.mxu0 %v1581_v28 }
 0x438   :  { %v1374_v44 = vadd.f32 %v1373_v34, %v1355_v37 }
 0x439   :  { %1617 = vmatpush.msrb.mxu0 %v1580_v31 }
 0x43a   :  { %v1406_v25 = vpop.f32.mrf.mxu1  ;;  %v1393_v53 = vadd.f32 %v1392_v42, %v1374_v44  ;;  %v1576_v42 = vld [vmem:[%s3498_s12 + $0x98] sm:$0xff] }
 0x43b   :  { %v3342_v9 = vadd.f32 %v1406_v25, %v1388_v49  ;;  %v1573_v49 = vld [vmem:[%s3498_s12 + $0x80] sm:$0xff] }
 0x43d   :  { %v1356_v29 = vpop.f32.mrf.mxu2  ;;  %v1529_v60 = vmul.f32 %v3342_v9, %v3342_v9 }
 0x43e   :  { %v1357_v45 = vadd.f32 %v1356_v29, %v1337_v18  ;;  %v1444_v4 = vpop.f32.mrf.mxu3 }
 0x43f   :  { %v1463_v13 = vpop.f32.mrf.mxu0 }
 0x440   :  { %v1376_v11 = vadd.f32 %v1375_v55, %v1357_v45  ;;  %v1574_v45 = vld [vmem:[%s3498_s12 + $0x88] sm:$0xff] }
 0x442   :  { %v1408_v35 = vpop.f32.mrf.mxu1  ;;  %v1395_v63 = vadd.f32 %v1394_v59, %v1376_v11 }
 0x443   :  { %v3340_v51 = vadd.f32 %v1408_v35, %v1390_v46  ;;  %v1579_v35 = vld [vmem:[%s3498_s12 + $0xb0] sm:$0xff] }
 0x444   :  { %1618 = vmatpush.msrb.mxu0 %v1579_v35 }
 0x445   :  { %v3335_v40 = vpop.f32.mrf.mxu2  ;;  %v1531_v58 = vmul.f32 %v3340_v51, %v3340_v51  ;;  %v1511_v61 = vadd.f32 %v3340_v51, %v3342_v9 }
 0x446   :  { %v1446_v29 = vpop.f32.mrf.mxu3  ;;  %1619 = vmatpush.msrb.mxu0 %v1578_v39  ;;  %v1445_v11 = vadd.f32 %v1444_v4, %v3335_v40 }
 0x447   :  { %v1537_v1 = vadd.f32 %v1531_v58, %v1529_v60  ;;  %v1465_v34 = vpop.f32.mrf.mxu0 }
 0x448   :  { %1620 = vmatpush.msrb.mxu0 %v1577_v41  ;;  %v1464_v60 = vadd.f32 %v1463_v13, %v1445_v11 }
 0x44a   :  { %v1411_v47 = vpop.f32.mrf.mxu1  ;;  %1621 = vmatpush.msrb.mxu0 %v1576_v42 }
 0x44b   :  { %v3344_v56 = vadd.f32 %v1411_v47, %v1393_v53 }
 0x44c   :  { %1622 = vmatpush.msrb.mxu0 %v1575_v43  ;;  %v1662_v43 = vld [vmem:[%s3499_s13 + $0x10] sm:$0xff] }
 0x44d   :  { %v3346_v57 = vpop.f32.mrf.mxu2  ;;  %v1533_v62 = vmul.f32 %v3344_v56, %v3344_v56  ;;  %v1512_v2 = vadd.f32 %v1511_v61, %v3344_v56  ;;  %1681 = vmatpush.msrb.mxu1 %v1662_v43 }
 0x44e   :  { %v1449_v44 = vpop.f32.mrf.mxu3  ;;  %v1447_v47 = vadd.f32 %v1446_v29, %v3346_v57  ;;  %1623 = vmatpush.msrb.mxu0 %v1574_v45  ;;  %v1663_v45 = vld [vmem:[%s3499_s13 + $0x18] sm:$0xff] }
 0x44f   :  { %v1538_v15 = vadd.f32 %v1537_v1, %v1533_v62  ;;  %v1468_v53 = vpop.f32.mrf.mxu0  ;;  %1701 = vmatpush.msrb.mxu3 %v1663_v45 }
 0x450   :  { %1624 = vmatpush.msrb.mxu0 %v1573_v49  ;;  %v1466_v59 = vadd.f32 %v1465_v34, %v1447_v47 }
 0x452   :  { %v1413_v52 = vpop.f32.mrf.mxu1 }
 0x453   :  { %v3360_v3 = vadd.f32 %v1413_v52, %v1395_v63 }
 0x455   :  { %v1513_v54 = vadd.f32 %v1512_v2, %v3360_v3  ;;  %v1535_v6 = vmul.f32 %v3360_v3, %v3360_v3  ;;  %v1430_v48 = vpop.f32.mrf.mxu2 }
 0x456   :  { %v1450_v58 = vadd.f32 %v1449_v44, %v1430_v48  ;;  %v1451_v63 = vpop.f32.mrf.mxu3  ;;  %v1660_v44 = vld [vmem:[%s3499_s13] sm:$0xff] }
 0x457   :  { %v1514_v16 = vrot.slane %v1513_v54, 4  ;;  %v1539_v26 = vadd.f32 %v1538_v15, %v1535_v6  ;;  %1682 = vmatpush.msrb.mxu1 %v1660_v44 }
 0x458   :  { %v1469_v62 = vadd.f32 %v1468_v53, %v1450_v58 }
 0x459   :  { %v1515_v8 = vadd.f32 %v1514_v16, %v1513_v54  ;;  %v1540_v12 = vrot.slane %v1539_v26, 4  ;;  %v1470_v54 = vpop.f32.mrf.mxu0 }
 0x45a   :  { %v1482_v20 = vpop.f32.mrf.mxu1 }
 0x45b   :  { %v1516_v18 = vrot.slane %v1515_v8, 2  ;;  %v1541_v19 = vadd.f32 %v1540_v12, %v1539_v26  ;;  %v1483_v0 = vadd.f32 %v1482_v20, %v1464_v60 }
 0x45d   :  { %v1517_v21 = vadd.f32 %v1516_v18, %v1515_v8  ;;  %v1542_v22 = vrot.slane %v1541_v19, 2  ;;  %v1432_v23 = vpop.f32.mrf.mxu2 }
 0x45e   :  { %v1452_v1 = vadd.f32 %v1451_v63, %v1432_v23 }
 0x45f   :  { %v1518_v25 = vrot.slane %v1517_v21, 1  ;;  %v1543_v27 = vadd.f32 %v1542_v22, %v1541_v19 }
 0x460   :  { %v1471_v48 = vadd.f32 %v1470_v54, %v1452_v1 }
 0x461   :  { %v1544_v30 = vrot.slane %v1543_v27, 1  ;;  %v1519_v32 = vadd.f32 %v1518_v25, %v1517_v21 }
 0x462   :  { %v1484_v36 = vpop.f32.mrf.mxu1 }
 0x463   :  { %v1545_v33 = vadd.f32 %v1544_v30, %v1543_v27  ;;  %v1485_v61 = vadd.f32 %v1484_v36, %v1466_v59  ;;  %v1646_v59 = vld [vmem:[%s3500_s10] sm:$0x1] }
 0x465   :  { %v1501_v37 = vpop.f32.mrf.mxu2  ;;  %v1555_v38 = vsel %vm185_vm3, %v1519_v32, %v1545_v33 }
 0x466   :  { %1605 = vmatmul.f32.vlgmr.msra.gmra.mxu3 %v1555_v38  ;;  %v3415_v5 = vadd.f32 %v1501_v37, %v1483_v0 }
 0x468   :  { %v1530_v10 = vmul.f32 %v3415_v5, %v3415_v5 }
 0x46a   :  { %v1487_v55 = vpop.f32.mrf.mxu1 }
 0x46b   :  { %v1488_v57 = vadd.f32 %v1487_v55, %v1469_v62  ;;  %v1653_v62 = vld [vmem:[%s3501_s11] sm:$0x1] }
 0x46d   :  { %v1503_v46 = vpop.f32.mrf.mxu2 }
 0x46e   :  { %v3413_v2 = vadd.f32 %v1503_v46, %v1485_v61 }
 0x470   :  { %v1532_v40 = vmul.f32 %v3413_v2, %v3413_v2  ;;  %v1520_v4 = vadd.f32 %v3413_v2, %v3415_v5 }
 0x472   :  { %v1489_v6 = vpop.f32.mrf.mxu1  ;;  %v1546_v8 = vadd.f32 %v1532_v40, %v1530_v10 }
 0x473   :  { %v1490_v16 = vadd.f32 %v1489_v6, %v1471_v48 }
 0x475   :  { %v1506_v52 = vpop.f32.mrf.mxu2 }
 0x476   :  { %v3417_v15 = vadd.f32 %v1506_v52, %v1488_v57 }
 0x478   :  { %v1534_v26 = vmul.f32 %v3417_v15, %v3417_v15  ;;  %v1521_v12 = vadd.f32 %v1520_v4, %v3417_v15 }
 0x47a   :  { %v1547_v14 = vadd.f32 %v1546_v8, %v1534_v26 }
 0x47d   :  { %v1508_v7 = vpop.f32.mrf.mxu2 }
 0x47e   :  { %v3428_v13 = vadd.f32 %v1508_v7, %v1490_v16 }
 0x480   :  { %v1522_v17 = vadd.f32 %v1521_v12, %v3428_v13  ;;  %v1536_v18 = vmul.f32 %v3428_v13, %v3428_v13 }
 0x482   :  { %v1523_v19 = vrot.slane %v1522_v17, 4  ;;  %v1548_v20 = vadd.f32 %v1547_v14, %v1536_v18 }
 0x484   :  { %v1524_v21 = vadd.f32 %v1523_v19, %v1522_v17  ;;  %v1549_v22 = vrot.slane %v1548_v20, 4 }
 0x486   :  { %v1525_v23 = vrot.slane %v1524_v21, 2  ;;  %v1550_v24 = vadd.f32 %v1549_v22, %v1548_v20 }
 0x488   :  { %v1526_v25 = vadd.f32 %v1525_v23, %v1524_v21  ;;  %v1551_v27 = vrot.slane %v1550_v24, 2 }
 0x48a   :  { %v1527_v28 = vrot.slane %v1526_v25, 1  ;;  %v1552_v29 = vadd.f32 %v1551_v27, %v1550_v24 }
 0x48c   :  { %v1553_v30 = vrot.slane %v1552_v29, 1  ;;  %v1528_v31 = vadd.f32 %v1527_v28, %v1526_v25 }
 0x48e   :  { %v1554_v32 = vadd.f32 %v1553_v30, %v1552_v29 }
 0x490   :  { %v1556_v33 = vsel %vm185_vm3, %v1528_v31, %v1554_v32 }
 0x491   :  { %1625 = vmatmul.f32.vlgmr.msrb.gmra.mxu0 %v1556_v33 }
 0x4e9   :  { %v1606_v34 = vpop.f32.mrf.mxu3 }
 0x50e   :  { %v1626_v35 = vpop.f32.mrf.mxu0 }
 0x50f   :  { %v1627_v36 = vadd.f32 %v1626_v35, %v1606_v34 }
 0x511   :  { %v1629_v37 = vmul.f32 %v1627_v36, %v2734_v50  ;;  %v1661_v50 = vld [vmem:[%s3499_s13 + $0x8] sm:$0xff] }
 0x512   :  { %1702 = vmatpush.msrb.mxu3 %v1661_v50 }
 0x513   :  { %v1630_v38 = vmul.f32 %v1629_v37, %v1629_v37 }
 0x515   :  { %v1632_v39 = vrot.slane %v1630_v38, 7 }
 0x517   :  { %v1634_v41 = vsub.f32 %v1629_v37, %v1632_v39 }
 0x519   :  { %v1635_v42 = vadd.f32 1e-05, %v1634_v41 }
 0x51b   :  { %2413 = vrsqrt.f32 %v1635_v42  ;;  %vm1642_vm2 = vweird.f32 %v1635_v42 }
 0x521   :  { %v2414_v46 = vpop.eup %2413 }
 0x522   :  { %v1637_v47 = vmul.f32 %v2414_v46, %v1635_v42  ;;  %vm1643_vm1 = vweird.f32 %v2414_v46 }
 0x523   :  { %vm1644_vm4 = vmor %vm1642_vm2, %vm1643_vm1 }
 0x524   :  { %v1638_v49 = vmul.f32 %v2414_v46, %v1637_v47 }
 0x526   :  { %v1639_v53 = vmul.f32 0.5, %v1638_v49 }
 0x528   :  { %v1640_v55 = vsub.f32 1.5, %v1639_v53 }
 0x52a   :  { %v1641_v11 = vmul.f32 %v2414_v46, %v1640_v55 }
 0x52c   :  { %v1645_v58 = vsel %vm1644_vm4, %v2414_v46, %v1641_v11 }
 0x52d   :  { %1648 = vst [vmem:[#allocation1] sm:$0xff] %v1645_v58 }
 0x534   :  { %v1650_v60 = vld [vmem:[#allocation1 + $0x1] ss:$9 sm:$0xff] }
 0x535   :  { %v1652_v61 = vmul.f32 %v1650_v60, %v1646_v59 }
 0x537   :  { %v1654_v63 = vmul.f32 %v1652_v61, %v1629_v37 }
 0x539   :  { %v1655_v52 = vsub.f32 %v1653_v62, %v1654_v63 }
 0x53b   :  { %v1657_v0 = vperm.slane %v1655_v52, 0 }
 0x53d   :  { %v1659_v1 = vsel %vm185_vm3, %v1652_v61, %v1657_v0 }
 0x53e   :  { %2278 = vmatmul.msk.f32.vlgmr.msrb.gmra.mxu1 %vm70_vm0, %v1659_v1  ;;  %2279 = vmatmul.msk.f32.vlgmr.msrb.gmra.mxu3 %vm70_vm0, %v1659_v1 }
 0x5bb   :  { %v1684_v57 = vpop.f32.mrf.mxu1 }
 0x5bc   :  { %v1707_v54 = vperm.slane %v1684_v57, 0  ;;  %v1717_v6 = vperm.slane %v1684_v57, 1 }
 0x5be   :  { %v1709_v40 = vmul.f32 %v1707_v54, %v3342_v9  ;;  %v1711_v48 = vmul.f32 %v1707_v54, %v3340_v51  ;;  %v1713_v10 = vmul.f32 %v1707_v54, %v3344_v56  ;;  %v1715_v4 = vmul.f32 %v1707_v54, %v3360_v3 }
 0x5c0   :  { %v1719_v16 = vadd.f32 %v1717_v6, %v1709_v40  ;;  %v1721_v26 = vadd.f32 %v1717_v6, %v1711_v48  ;;  %v1723_v7 = vadd.f32 %v1717_v6, %v1713_v10  ;;  %v1725_v8 = vadd.f32 %v1717_v6, %v1715_v4 }
 0x5c1   :  { %v1704_v12 = vpop.f32.mrf.mxu3 }
 0x5c2   :  { %v1727_v14 = vmax.f32 %v1719_v16, 0.0  ;;  %v1729_v17 = vmax.f32 %v1721_v26, 0.0  ;;  %v1731_v18 = vmax.f32 %v1723_v7, 0.0  ;;  %v1733_v19 = vmax.f32 %v1725_v8, 0.0 }
 0x5c3   :  { %v1708_v20 = vperm.slane %v1704_v12, 0  ;;  %v1718_v9 = vperm.slane %v1704_v12, 1 }
 0x5c4   :  { %1735 = vst [vmem:[%s3502_s14] sm:$0xff] %v1727_v14 }
 0x5c5   :  { %1737 = vst [vmem:[%s3502_s14 + $0x10] sm:$0xff] %v1729_v17  ;;  %v1710_v51 = vmul.f32 %v1708_v20, %v3415_v5  ;;  %v1712_v56 = vmul.f32 %v1708_v20, %v3413_v2  ;;  %v1714_v3 = vmul.f32 %v1708_v20, %v3417_v15  ;;  %v1716_v21 = vmul.f32 %v1708_v20, %v3428_v13 }
 0x5c6   :  { %1739 = vst [vmem:[%s3502_s14 + $0x20] sm:$0xff] %v1731_v18 }
 0x5c7   :  { %1741 = vst [vmem:[%s3502_s14 + $0x30] sm:$0xff] %v1733_v19  ;;  %v1720_v22 = vadd.f32 %v1718_v9, %v1710_v51  ;;  %v1722_v23 = vadd.f32 %v1718_v9, %v1712_v56  ;;  %v1724_v24 = vadd.f32 %v1718_v9, %v1714_v3  ;;  %v1726_v25 = vadd.f32 %v1718_v9, %v1716_v21 }
 0x5c9   :  { %v1728_v27 = vmax.f32 %v1720_v22, 0.0  ;;  %v1730_v5 = vmax.f32 %v1722_v23, 0.0  ;;  %v1732_v28 = vmax.f32 %v1724_v24, 0.0  ;;  %v1734_v2 = vmax.f32 %v1726_v25, 0.0 }
 0x5cb   :  { %1736 = vst [vmem:[%s3502_s14 + $0x8] sm:$0xff] %v1728_v27 }
 0x5cc   :  { %1738 = vst [vmem:[%s3502_s14 + $0x18] sm:$0xff] %v1730_v5 }
 0x5cd   :  { %1740 = vst [vmem:[%s3502_s14 + $0x28] sm:$0xff] %v1732_v28 }
 0x5ce   :  { %1742 = vst [vmem:[%s3502_s14 + $0x38] sm:$0xff] %v1734_v2 }

</bundles_post_ra>
